<compile_context>
chip_gen: v7x
topology: tpu7x:2x2x1
jax: 0.10.0
libtpu: 0.0.40
codegen_flags: <defaults>
</compile_context>

<pallas_src>
from functools import partial

import numpy as np
import jax
import jax.numpy as jnp
from jax.experimental import pallas as pl
from jax.experimental.pallas import tpu as pltpu


def _round_up(x, m):
    return (x + m - 1) // m * m


_VMEM_LIMIT = 48 * 1024 * 1024


# ----------------------------------------------------------------------------
# Padded-frame activation format for stride-1 3x3 convs
#   rows = front + mrows + front
#   mrows = round_up((H+2)*(W+2), 16), front = round_up(W+3, 16)
# Positions [front, front+(H+2)*(W+2)) hold the zero-padded image row-major;
# halo / tail / frame-border rows are kept at exactly zero by the conv
# epilogue, so the next conv and the residual add read the buffer directly.
# ----------------------------------------------------------------------------
def _pf_geom(h, w):
    hp, wp = h + 2, w + 2
    hpwp = hp * wp
    mrows = _round_up(hpwp, 16)
    front = _round_up(wp + 1, 16)
    rows = mrows + 2 * front
    return hp, wp, hpwp, mrows, front, rows


def to_padded_format(x):
    """x: NHWC -> padded-frame [N, rows, C] (bf16)."""
    n, h, w, c = x.shape
    hp, wp, hpwp, mrows, front, rows = _pf_geom(h, w)
    xp = jnp.pad(x, ((0, 0), (1, 1), (1, 1), (0, 0))).reshape(n, hpwp, c)
    xp = jnp.pad(xp, ((0, 0), (front, rows - front - hpwp), (0, 0)))
    return xp.astype(jnp.bfloat16)


def from_padded_format(x_pf, h, w):
    """padded-frame [N, rows, C] -> NHWC [N, H, W, C]."""
    n, _, c = x_pf.shape
    hp, wp, hpwp, mrows, front, rows = _pf_geom(h, w)
    y = x_pf[:, front:front + hpwp, :].reshape(n, hp, wp, c)
    return y[:, 1:1 + h, 1:1 + w, :]


# ----------------------------------------------------------------------------
# Fused matmul kernel:  out = [relu]( (A @ W) [* scale] + shift )
# ----------------------------------------------------------------------------
def _matmul_bn_kernel(*refs, relu, has_scale):
    if has_scale:
        a_ref, w_ref, s_ref, b_ref, o_ref = refs
    else:
        a_ref, w_ref, b_ref, o_ref = refs
        s_ref = None
    acc = jnp.dot(a_ref[...], w_ref[...], preferred_element_type=jnp.float32)
    if has_scale:
        acc = acc * s_ref[...]
    acc = acc + b_ref[...]
    if relu:
        acc = jnp.maximum(acc, 0.0)
    o_ref[...] = acc.astype(o_ref.dtype)


def fused_matmul(a, w, scale, shift, relu=False, out_dtype=jnp.bfloat16):
    """a:[M,K] w:[K,N] scale(optional)/shift:[N] -> [M,N]."""
    M, K = a.shape
    _, N = w.shape
    tm = min(512, _round_up(M, 8))
    tn = 256 if N >= 256 else 128      # tn tracks the 256-wide MXU on v6e/v7x
    Mp, Np, Kp = _round_up(M, tm), _round_up(N, tn), _round_up(K, 128)

    a_p = jnp.pad(a, ((0, Mp - M), (0, Kp - K))).astype(jnp.bfloat16)
    w_p = jnp.pad(w, ((0, Kp - K), (0, Np - N))).astype(jnp.bfloat16)
    b_p = jnp.pad(shift, (0, Np - N)).astype(jnp.float32).reshape(1, Np)

    in_specs = [
        pl.BlockSpec((tm, Kp), lambda i, j: (i, 0)),   # A reused across j sweep
        pl.BlockSpec((Kp, tn), lambda i, j: (0, j)),   # W fully K-resident
    ]
    args = [a_p, w_p]
    has_scale = scale is not None
    if has_scale:
        s_p = jnp.pad(scale, (0, Np - N)).astype(jnp.float32).reshape(1, Np)
        in_specs.append(pl.BlockSpec((1, tn), lambda i, j: (0, j)))
        args.append(s_p)
    in_specs.append(pl.BlockSpec((1, tn), lambda i, j: (0, j)))
    args.append(b_p)

    out = pl.pallas_call(
        partial(_matmul_bn_kernel, relu=relu, has_scale=has_scale),
        out_shape=jax.ShapeDtypeStruct((Mp, Np), out_dtype),
        grid_spec=pltpu.PrefetchScalarGridSpec(
            num_scalar_prefetch=0,
            grid=(Mp // tm, Np // tn),
            in_specs=in_specs,
            out_specs=pl.BlockSpec((tm, tn), lambda i, j: (i, j)),
        ),
        compiler_params=pltpu.CompilerParams(
            dimension_semantics=("parallel", "parallel"),
            vmem_limit_bytes=_VMEM_LIMIT),
    )(*args)
    return out[:M, :N]


# ----------------------------------------------------------------------------
# Tap-fused 3x3 stride-1 conv + BN (+ residual) (+ ReLU), padded-frame I/O.
# 9 statically shifted windows of the same VMEM block, register-accumulated,
# single store; epilogue zeroes border/halo rows so the output is directly
# consumable by the next conv.
# ----------------------------------------------------------------------------
def _conv3x3_s1_kernel(x_ref, w_ref, s_ref, b_ref, m_ref, *refs,
                       taps, cin, relu, front, mrows):
    if len(refs) == 2:
        r_ref, o_ref = refs
    else:
        (o_ref,) = refs
        r_ref = None
    cout = o_ref.shape[2]

    acc = jnp.zeros((mrows, cout), jnp.float32)
    for t, off in enumerate(taps):                       # 9 static windows
        acc = acc + jnp.dot(x_ref[0, off:off + mrows, :],
                            w_ref[t * cin:(t + 1) * cin, :],
                            preferred_element_type=jnp.float32)

    out = acc * s_ref[...] + b_ref[...]
    if r_ref is not None:
        out = out + r_ref[0, front:front + mrows, :].astype(jnp.float32)
    if relu:
        out = jnp.maximum(out, 0.0)
    out = out * m_ref[...]                               # zero border / tail rows

    zero_halo = jnp.zeros((front, cout), o_ref.dtype)
    o_ref[0, front:front + mrows, :] = out.astype(o_ref.dtype)
    o_ref[0, 0:front, :] = zero_halo
    o_ref[0, front + mrows:, :] = zero_halo


def conv3x3_s1_bn(x_pf, h, w, w_oihw, scale, shift, relu, residual_pf=None):
    """padded-frame [N,rows,Cin] -> padded-frame [N,rows,Cout]."""
    n, rows, c = x_pf.shape
    cout = w_oihw.shape[0]
    hp, wp, hpwp, mrows, front, rows_g = _pf_geom(h, w)
    assert rows == rows_g

    w_mat = jnp.transpose(w_oihw, (2, 3, 1, 0)).reshape(9 * c, cout)
    w_mat = w_mat.astype(jnp.bfloat16)
    s_p = scale.astype(jnp.float32).reshape(1, cout)
    b_p = shift.astype(jnp.float32).reshape(1, cout)

    # interior-row mask (1 on valid conv outputs, 0 on frame border / tail)
    p = np.arange(mrows)
    yy, xx = p // wp, p % wp
    interior = ((p < hpwp) & (yy >= 1) & (yy <= hp - 2)
                & (xx >= 1) & (xx <= wp - 2))
    mask = jnp.asarray(interior.astype(np.float32)[:, None])   # [mrows, 1]

    taps = tuple(front + (i - 1) * wp + (j - 1)
                 for i in range(3) for j in range(3))

    in_specs = [
        pl.BlockSpec((1, rows, c), lambda nb: (nb, 0, 0)),
        pl.BlockSpec((9 * c, cout), lambda nb: (0, 0)),
        pl.BlockSpec((1, cout), lambda nb: (0, 0)),
        pl.BlockSpec((1, cout), lambda nb: (0, 0)),
        pl.BlockSpec((mrows, 1), lambda nb: (0, 0)),
    ]
    args = [x_pf, w_mat, s_p, b_p, mask]
    if residual_pf is not None:
        in_specs.append(pl.BlockSpec((1, rows, cout), lambda nb: (nb, 0, 0)))
        args.append(residual_pf.astype(jnp.bfloat16))

    return pl.pallas_call(
        partial(_conv3x3_s1_kernel, taps=taps, cin=c, relu=relu,
                front=front, mrows=mrows),
        out_shape=jax.ShapeDtypeStruct((n, rows, cout), jnp.bfloat16),
        grid_spec=pltpu.PrefetchScalarGridSpec(
            num_scalar_prefetch=0,
            grid=(n,),
            in_specs=in_specs,
            out_specs=pl.BlockSpec((1, rows, cout), lambda nb: (nb, 0, 0)),
        ),
        compiler_params=pltpu.CompilerParams(
            dimension_semantics=("parallel",),
            vmem_limit_bytes=_VMEM_LIMIT),
    )(*args)


# ----------------------------------------------------------------------------
# Stride-2 3x3 ops (conv / maxpool) via even/odd phase decomposition:
# padded input split into 4 phase images, flattened -> the 9 taps become
# contiguous row windows of the phase buffers (no im2col, no strided slices).
# ----------------------------------------------------------------------------
def _phase_decompose(x, pad_value):
    """NHWC -> ([N, 4, prows, C], geom) for 3x3 / stride-2 / pad-1 ops."""
    n, h, w, c = x.shape
    assert h % 2 == 0 and w % 2 == 0
    hp, wp = h + 2, w + 2
    hp2, wp2 = hp // 2, wp // 2
    oh, ow = h // 2, w // 2
    mq = _round_up(hp2 * wp2, 8)
    prows = _round_up(mq + wp2 + 1, 8)
    xp = jnp.pad(x, ((0, 0), (1, 1), (1, 1), (0, 0)), constant_values=pad_value)
    xp = xp.reshape(n, hp2, 2, wp2, 2, c).transpose(0, 2, 4, 1, 3, 5)
    xp = xp.reshape(n, 4, hp2 * wp2, c)
    xp = jnp.pad(xp, ((0, 0), (0, 0), (0, prows - hp2 * wp2), (0, 0)),
                 constant_values=pad_value)
    return xp, (hp2, wp2, oh, ow, mq, prows)


def _conv3x3_s2_kernel(x_ref, w_ref, s_ref, b_ref, o_ref, *, cin, relu, wp2, mq):
    cout = o_ref.shape[2]
    acc = jnp.zeros((mq, cout), jnp.float32)
    for t in range(9):
        i, j = t // 3, t % 3
        ph = 2 * (i % 2) + (j % 2)
        off = (i // 2) * wp2 + (j // 2)
        acc = acc + jnp.dot(x_ref[0, ph, off:off + mq, :],
                            w_ref[t * cin:(t + 1) * cin, :],
                            preferred_element_type=jnp.float32)
    out = acc * s_ref[...] + b_ref[...]
    if relu:
        out = jnp.maximum(out, 0.0)
    o_ref[0] = out.astype(o_ref.dtype)


def conv3x3_s2_bn(x, w_oihw, scale, shift, relu):
    """3x3 / stride 2 / pad 1 conv + BN (+ReLU). x: NHWC bf16 -> NHWC bf16."""
    n, h, w, c = x.shape
    cout = w_oihw.shape[0]
    xph, (hp2, wp2, oh, ow, mq, prows) = _phase_decompose(
        x.astype(jnp.bfloat16), 0.0)
    w_mat = jnp.transpose(w_oihw, (2, 3, 1, 0)).reshape(9 * c, cout)
    w_mat = w_mat.astype(jnp.bfloat16)
    s_p = scale.astype(jnp.float32).reshape(1, cout)
    b_p = shift.astype(jnp.float32).reshape(1, cout)
    out = pl.pallas_call(
        partial(_conv3x3_s2_kernel, cin=c, relu=relu, wp2=wp2, mq=mq),
        out_shape=jax.ShapeDtypeStruct((n, mq, cout), jnp.bfloat16),
        grid_spec=pltpu.PrefetchScalarGridSpec(
            num_scalar_prefetch=0,
            grid=(n,),
            in_specs=[pl.BlockSpec((1, 4, prows, c), lambda nb: (nb, 0, 0, 0)),
                      pl.BlockSpec((9 * c, cout), lambda nb: (0, 0)),
                      pl.BlockSpec((1, cout), lambda nb: (0, 0)),
                      pl.BlockSpec((1, cout), lambda nb: (0, 0))],
            out_specs=pl.BlockSpec((1, mq, cout), lambda nb: (nb, 0, 0)),
        ),
        compiler_params=pltpu.CompilerParams(
            dimension_semantics=("parallel",),
            vmem_limit_bytes=_VMEM_LIMIT),
    )(xph, w_mat, s_p, b_p)
    y = out[:, :hp2 * wp2, :].reshape(n, hp2, wp2, cout)
    return y[:, :oh, :ow, :]


def _maxpool_s2_kernel(x_ref, o_ref, *, wp2, mq):
    m = None
    for t in range(9):
        i, j = t // 3, t % 3
        ph = 2 * (i % 2) + (j % 2)
        off = (i // 2) * wp2 + (j // 2)
        v = x_ref[0, ph, off:off + mq, :]
        m = v if m is None else jnp.maximum(m, v)
    o_ref[0] = m


def maxpool_3x3_s2(x):
    """MaxPool k3 s2 p1 (pad value -inf). x: NHWC bf16 -> NHWC bf16."""
    n, h, w, c = x.shape
    xph, (hp2, wp2, oh, ow, mq, prows) = _phase_decompose(x, -jnp.inf)
    out = pl.pallas_call(
        partial(_maxpool_s2_kernel, wp2=wp2, mq=mq),
        out_shape=jax.ShapeDtypeStruct((n, mq, c), x.dtype),
        grid_spec=pltpu.PrefetchScalarGridSpec(
            num_scalar_prefetch=0,
            grid=(n,),
            in_specs=[pl.BlockSpec((1, 4, prows, c), lambda nb: (nb, 0, 0, 0))],
            out_specs=pl.BlockSpec((1, mq, c), lambda nb: (nb, 0, 0)),
        ),
        compiler_params=pltpu.CompilerParams(
            dimension_semantics=("parallel",),
            vmem_limit_bytes=_VMEM_LIMIT),
    )(xph)
    y = out[:, :hp2 * wp2, :].reshape(n, hp2, wp2, c)
    return y[:, :oh, :ow, :]


# ----------------------------------------------------------------------------
# Fused global avg-pool + FC (AdaptiveAvgPool2d((1,1)) + flatten + Linear)
# ----------------------------------------------------------------------------
def _pool_fc_kernel(x_ref, w_ref, b_ref, o_ref):
    pooled = jnp.mean(x_ref[...].astype(jnp.float32), axis=1)
    out = jnp.dot(pooled.astype(jnp.bfloat16), w_ref[...],
                  preferred_element_type=jnp.float32)
    o_ref[...] = out + b_ref[...]


def pool_fc(x, w, b):
    """x: [N, H*W, C] (bf16); w: [C, classes]; b: [classes] -> fp32 logits."""
    n, hw, c = x.shape
    nc = w.shape[1]
    ncp = _round_up(nc, 128)
    tb = n if n <= 8 else 8
    npad = _round_up(n, tb)
    x_p = jnp.pad(x, ((0, npad - n), (0, 0), (0, 0))).astype(jnp.bfloat16)
    w_p = jnp.pad(w, ((0, 0), (0, ncp - nc))).astype(jnp.bfloat16)
    b_p = jnp.pad(b, (0, ncp - nc)).astype(jnp.float32).reshape(1, ncp)
    out = pl.pallas_call(
        _pool_fc_kernel,
        out_shape=jax.ShapeDtypeStruct((npad, ncp), jnp.float32),
        grid_spec=pltpu.PrefetchScalarGridSpec(
            num_scalar_prefetch=0,
            grid=(npad // tb,),
            in_specs=[pl.BlockSpec((tb, hw, c), lambda i: (i, 0, 0)),
                      pl.BlockSpec((c, ncp), lambda i: (0, 0)),
                      pl.BlockSpec((1, ncp), lambda i: (0, 0))],
            out_specs=pl.BlockSpec((tb, ncp), lambda i: (i, 0)),
        ),
        compiler_params=pltpu.CompilerParams(
            dimension_semantics=("parallel",),
            vmem_limit_bytes=_VMEM_LIMIT),
    )(x_p, w_p, b_p)
    return out[:n, :nc]


# ----------------------------------------------------------------------------
# Stem 7x7/s2 conv (tiny cin=3 -> im2col is cheap) and 1x1 downsample convs
# ----------------------------------------------------------------------------
def _im2col(x, kh, kw, stride, pad):
    n, h, w, c = x.shape
    oh = (h + 2 * pad - kh) // stride + 1
    ow = (w + 2 * pad - kw) // stride + 1
    xp = jnp.pad(x, ((0, 0), (pad, pad), (pad, pad), (0, 0)))
    cols = []
    for i in range(kh):
        for j in range(kw):
            cols.append(xp[:, i:i + stride * (oh - 1) + 1:stride,
                           j:j + stride * (ow - 1) + 1:stride, :])
    patches = jnp.stack(cols, axis=3)                  # [N, OH, OW, KH*KW, C]
    return patches.reshape(n * oh * ow, kh * kw * c), (n, oh, ow)


def conv_stem_bn(x, w_oihw, scale, shift, relu):
    cout, cin, kh, kw = w_oihw.shape
    patches, (n, oh, ow) = _im2col(x, kh, kw, stride=2, pad=3)
    w_mat = jnp.transpose(w_oihw, (2, 3, 1, 0)).reshape(kh * kw * cin, cout)
    out = fused_matmul(patches, w_mat, scale, shift, relu=relu)
    return out.reshape(n, oh, ow, cout)


def conv1x1_bn(x, w_oihw, scale, shift, stride):
    n, h, w, c = x.shape
    cout = w_oihw.shape[0]
    xs = x[:, ::stride, ::stride, :]
    oh, ow = xs.shape[1], xs.shape[2]
    w_mat = jnp.transpose(w_oihw.reshape(cout, c), (1, 0))
    out = fused_matmul(xs.reshape(n * oh * ow, c), w_mat, scale, shift,
                       relu=False)
    return out.reshape(n, oh, ow, cout)


# ----------------------------------------------------------------------------
# ResNet (BasicBlock) assembly
# ----------------------------------------------------------------------------
def basic_block(x_pf, h, w, p):
    stride = p["stride"]
    if stride == 1:
        h1_pf = conv3x3_s1_bn(x_pf, h, w, p["w1"], p["s1"], p["b1"], relu=True)
        oh, ow = h, w
        if "wd" in p:
            x_nhwc = from_padded_format(x_pf, h, w)
            sc = conv1x1_bn(x_nhwc, p["wd"], p["sd"], p["bd"], stride=1)
            shortcut_pf = to_padded_format(sc)
        else:
            shortcut_pf = x_pf
    else:
        x_nhwc = from_padded_format(x_pf, h, w)
        h1 = conv3x3_s2_bn(x_nhwc, p["w1"], p["s1"], p["b1"], relu=True)
        oh, ow = h // 2, w // 2
        h1_pf = to_padded_format(h1)
        sc = conv1x1_bn(x_nhwc, p["wd"], p["sd"], p["bd"], stride=2)
        shortcut_pf = to_padded_format(sc)
    out_pf = conv3x3_s1_bn(h1_pf, oh, ow, p["w2"], p["s2"], p["b2"],
                           relu=True, residual_pf=shortcut_pf)
    return out_pf, oh, ow


def resnet_forward(x_nchw, params):
    # layout: input NCHW (PyTorch), internal NHWC / padded-frame bf16
    x = jnp.transpose(x_nchw, (0, 2, 3, 1)).astype(jnp.bfloat16)
    x = conv_stem_bn(x, params["conv1_w"], params["bn1_s"], params["bn1_b"],
                     relu=True)
    x = maxpool_3x3_s2(x)
    n, h, w, c = x.shape
    x_pf = to_padded_format(x)
    for stage in params["stages"]:
        for blk in stage:
            x_pf, h, w = basic_block(x_pf, h, w, blk)
    x = from_padded_format(x_pf, h, w)
    n, h, w, c = x.shape
    return pool_fc(x.reshape(n, h * w, c),
                   params["fc_w"], params["fc_b"])      # [N, num_classes] fp32


# ----------------------------------------------------------------------------
# Deterministic parameter init (matches module __init__ shapes, expansion=1)
# ----------------------------------------------------------------------------
def _init_bn(key, c):
    k1, k2 = jax.random.split(key)
    gamma = 1.0 + 0.1 * jax.random.normal(k1, (c,), jnp.float32)
    beta = 0.1 * jax.random.normal(k2, (c,), jnp.float32)
    mean = jnp.zeros((c,), jnp.float32)
    var = jnp.ones((c,), jnp.float32)
    scale = gamma / jnp.sqrt(var + 1e-5)
    shift = beta - mean * scale
    return scale, shift


def init_resnet_params(key, layers=(1, 1, 1, 1), num_classes=10):
    expansion = 1
    params = {}
    key, k = jax.random.split(key)
    params["conv1_w"] = 0.05 * jax.random.normal(k, (64, 3, 7, 7), jnp.float32)
    key, k = jax.random.split(key)
    params["bn1_s"], params["bn1_b"] = _init_bn(k, 64)

    in_c = 64
    stages = []
    for out_c, nblocks, first_stride in zip(
            (64, 128, 256, 512), layers, (1, 2, 2, 2)):
        stage = []
        strides = [first_stride] + [1] * (nblocks - 1)
        for stride in strides:
            blk = {"stride": stride}
            key, k = jax.random.split(key)
            blk["w1"] = 0.05 * jax.random.normal(k, (out_c, in_c, 3, 3),
                                                 jnp.float32)
            key, k = jax.random.split(key)
            blk["s1"], blk["b1"] = _init_bn(k, out_c)
            key, k = jax.random.split(key)
            blk["w2"] = 0.05 * jax.random.normal(k, (out_c, out_c, 3, 3),
                                                 jnp.float32)
            key, k = jax.random.split(key)
            blk["s2"], blk["b2"] = _init_bn(k, out_c)
            if stride != 1 or in_c != out_c * expansion:
                key, k = jax.random.split(key)
                blk["wd"] = 0.05 * jax.random.normal(
                    k, (out_c * expansion, in_c, 1, 1), jnp.float32)
                key, k = jax.random.split(key)
                blk["sd"], blk["bd"] = _init_bn(k, out_c * expansion)
            stage.append(blk)
            in_c = out_c * expansion
        stages.append(stage)
    params["stages"] = stages

    key, k = jax.random.split(key)
    params["fc_w"] = 0.05 * jax.random.normal(
        k, (512 * expansion, num_classes), jnp.float32)  # stored as [in, out]
    key, k = jax.random.split(key)
    params["fc_b"] = 0.05 * jax.random.normal(k, (num_classes,), jnp.float32)
    return params


if __name__ == "__main__":
    key = jax.random.PRNGKey(0)
    pkey, xkey = jax.random.split(key)
    params = init_resnet_params(pkey, layers=(1, 1, 1, 1), num_classes=10)

    # small input, NCHW like PyTorch: batch=2, channels=3, spatial=64
    x = jax.random.normal(xkey, (2, 3, 64, 64), jnp.float32)

    logits = resnet_forward(x, params)
    jax.block_until_ready(logits)
    assert logits.shape == (2, 10) and logits.dtype == jnp.float32
    assert bool(jnp.all(jnp.isfinite(logits)))
    print("KERNEL_OK")
</pallas_src>

<mosaic_0001>
module attributes {stable_mosaic.version = 11 : i64} {
  func.func @_matmul_bn_kernel(%arg0: i32, %arg1: i32, %arg2: memref<512x256xbf16, #tpu.memory_space<vmem>>, %arg3: memref<256x128xbf16, #tpu.memory_space<vmem>>, %arg4: memref<1x128xf32, #tpu.memory_space<vmem>>, %arg5: memref<1x128xf32, #tpu.memory_space<vmem>>, %arg6: memref<512x128xbf16, #tpu.memory_space<vmem>>) attributes {dimension_semantics = [#tpu.dimension_semantics<parallel>, #tpu.dimension_semantics<parallel>], iteration_bounds = array<i64: 4, 1>, scalar_prefetch = 0 : i64, scratch_operands = 0 : i64, tpu.core_type = #tpu.core_type<tc>, window_params = [{transform_indices = @transform_0, window_bounds = array<i64: 512, 256>}, {transform_indices = @transform_1, window_bounds = array<i64: 256, 128>}, {transform_indices = @transform_2, window_bounds = array<i64: 1, 128>}, {transform_indices = @transform_3, window_bounds = array<i64: 1, 128>}, {transform_indices = @transform_4, window_bounds = array<i64: 512, 128>}]} {
    %c0 = arith.constant 0 : index
    %c0_0 = arith.constant 0 : index
    %0 = vector.load %arg2[%c0, %c0_0] : memref<512x256xbf16, #tpu.memory_space<vmem>>, vector<512x256xbf16>
    %c0_1 = arith.constant 0 : index
    %c0_2 = arith.constant 0 : index
    %1 = vector.load %arg3[%c0_1, %c0_2] : memref<256x128xbf16, #tpu.memory_space<vmem>>, vector<256x128xbf16>
    %cst = arith.constant dense<0.000000e+00> : vector<512x128xf32>
    %2 = tpu.matmul %0, %1, %cst {dimension_numbers = #tpu.dot_dimension_numbers<[1], [0], [0], [1], [0, 0, 1, 1], [], []>} : vector<512x256xbf16>, vector<256x128xbf16>, vector<512x128xf32> -> vector<512x128xf32>
    %c0_3 = arith.constant 0 : index
    %c0_4 = arith.constant 0 : index
    %3 = vector.load %arg4[%c0_3, %c0_4] : memref<1x128xf32, #tpu.memory_space<vmem>>, vector<1x128xf32>
    %4 = vector.broadcast %3 : vector<1x128xf32> to vector<512x128xf32>
    %5 = arith.mulf %2, %4 : vector<512x128xf32>
    %c0_5 = arith.constant 0 : index
    %c0_6 = arith.constant 0 : index
    %6 = vector.load %arg5[%c0_5, %c0_6] : memref<1x128xf32, #tpu.memory_space<vmem>>, vector<1x128xf32>
    %7 = vector.broadcast %6 : vector<1x128xf32> to vector<512x128xf32>
    %8 = arith.addf %5, %7 : vector<512x128xf32>
    %cst_7 = arith.constant 0.000000e+00 : f32
    %9 = vector.broadcast %cst_7 : f32 to vector<512x128xf32>
    %10 = arith.maximumf %8, %9 : vector<512x128xf32>
    %11 = arith.truncf %10 : vector<512x128xf32> to vector<512x128xbf16>
    %c0_8 = arith.constant 0 : index
    %c0_9 = arith.constant 0 : index
    %12 = vector.load %arg6[%c0_8, %c0_9] : memref<512x128xbf16, #tpu.memory_space<vmem>>, vector<512x128xbf16>
    tpu.vector_store %arg6[%c0_8, %c0_9], %11 {strides = array<i32>} : memref<512x128xbf16, #tpu.memory_space<vmem>>, vector<512x128xbf16>,
    return
  }
  func.func @transform_0(%arg0: i32, %arg1: i32) -> (i32, i32) {
    %c0_i32 = arith.constant 0 : i32
    %c0_i32_0 = arith.constant 0 : i32
    return %arg0, %c0_i32 : i32, i32
  }
  func.func @transform_1(%arg0: i32, %arg1: i32) -> (i32, i32) {
    %c0_i32 = arith.constant 0 : i32
    %c0_i32_0 = arith.constant 0 : i32
    return %c0_i32, %arg1 : i32, i32
  }
  func.func @transform_2(%arg0: i32, %arg1: i32) -> (i32, i32) {
    %c0_i32 = arith.constant 0 : i32
    %c0_i32_0 = arith.constant 0 : i32
    return %c0_i32, %arg1 : i32, i32
  }
  func.func @transform_3(%arg0: i32, %arg1: i32) -> (i32, i32) {
    %c0_i32 = arith.constant 0 : i32
    %c0_i32_0 = arith.constant 0 : i32
    return %c0_i32, %arg1 : i32, i32
  }
  func.func @transform_4(%arg0: i32, %arg1: i32) -> (i32, i32) {
    %c0_i32 = arith.constant 0 : i32
    return %arg0, %arg1 : i32, i32
  }
}

</mosaic_0001>

<bundles_post_ra>
// kernel: tpu_custom_call.1
= control target key start
LH: loop header
LB: loop body
LE: loop exit
PB: predicated region body
PF: predicated region fallthrough
CT: control target
= control target key end

     0   :  { %9 = vsyncpa [#allocation3], 0  ;;  %s3063_s0 = inlined_call_operand.hbm [shape: bf16[2048,256], index: 0, kind: input, shape index: {}]   ;;  %s3064_s1 = inlined_call_operand.hbm [shape: bf16[256,128], index: 1, kind: input, shape index: {}]   ;;  %s3065_s2 = inlined_call_operand.vmem [shape: f32[1,128], index: 2, kind: input, shape index: {}]   ;;  %s3066_s3 = inlined_call_operand.vmem [shape: f32[1,128], index: 3, kind: input, shape index: {}]   ;;  %s3067_s4 = inlined_call_operand.hbm [shape: bf16[2048,128], index: 4, kind: output, shape index: {}]  }
   0x1   :  { %11 = vsyncpa [#allocation3 + $0x1], 0 }
   0x2   :  { %12 = vsyncpa [#allocation6], 0 }
   0x3   :  { %13 = vsyncpa [#allocation4], 0 }
   0x4   :  { %15 = vsyncpa [#allocation4 + $0x1], 0  ;;  %s2574_s15 = smov 0   ;;  %s2576_s16 = smov 0  }
   0x5   :  { %s2578_s17 = smov 0   ;;  %s2580_s18 = smov 0  }
   0x6   :  { %s2582_s19 = smov 0   ;;  %s2584_s20 = smov 0  }
   0x7 LB: > { %s1745_s21 = sadd.s32 4294967295, %s2537_s20   ;;  %s1746_s22 = sadd.s32 4294967294, %s2537_s20   ;;  %s2537_s20 = sphi %s2584_s20, %s21_s20   ;;  %s2533_s19 = sphi %s2582_s19, %s3090_s19   ;;  %s2529_s18 = sphi %s2580_s18, %s3089_s18   ;;  %s2525_s17 = sphi %s2578_s17, %s3088_s17   ;;  %s2521_s16 = sphi %s2576_s16, %s3087_s16   ;;  %s2517_s15 = sphi %s2574_s15, %s3086_s15  }
   0x8   : > { %p53_p0 = scmp.ne.s32.totalorder %s2521_s16, %s2517_s15  ;;  %p2608_p1 = scmp.eq.s32.totalorder %s1745_s21, 0 }
   0x9   : > { %p2612_p2 = scmp.eq.s32.totalorder %s1745_s21, 3  ;;  %p163_p3 = scmp.eq.s32.totalorder %s1746_s22, 3 }
   0xa   : > { %s3072_s23 = scalar_select %p2608_p1, 1, 0 }
   0xb   : > { %s3073_s24 = scalar_select %p2612_p2, 1, 0 }
   0xc   : > { %p2618_p4 = por %p2608_p1, %p53_p0  ;;  %p1747_p5 = scmp.ge.s32.totalorder %s2537_s20, 1 }
   0xd   : > { %p2623_p6 = por %p163_p3, %p53_p0  ;;  %p170_p7 = scmp.lt.s32.totalorder %s2537_s20, 5 }
   0xe   : > { %s3074_s25 = scalar_select %p2618_p4, 1, 0 }
   0xf   : > { %s3075_s26 = scalar_select %p2623_p6, 1, 0 }
  0x10   : > { %p2628_p8 = pnand %p1747_p5, %p170_p7  ;;  %s2539_s28 = smov [#allocation5]  }
  0x11   : > { %s184_s29 = sshll.u32 %s2539_s28, 4  ;;  %s33_s5 = sadd.s32 1, %s2533_s19  ;;  %s185_s29 = int_to_ptr.vmem [resolvable:$true] %s184_s29 }
  0x12   : > { %s3076_s27 = scalar_select %p2628_p8, 1, 0 }
  0x13   : > { %p2209_p9 = pneg %p2628_p8  ;;  %s2393_s8 = scalar_lea.hbm %s3064_s1, 2048 }
  0x14   : > { %p2394_p11 = scmp.ne.s32.totalorder %s3064_s1, %s2393_s8  ;;  %p2400_p3 = scmp.lt.u32.totalorder %s2393_s8, %s3064_s1 }
  0x15   : > { %p2636_p10 = pnand %p2209_p9, %p2608_p1 }
  0x17   : > { %p2395_p12 = pneg %p2636_p10 }
  0x19   : > { %p2396_p13 = pnand %p2395_p12, %p2394_p11 }
  0x1b   : > { %p2397_p0 = pneg %p2396_p13 }
  0x1d   : > { %p2402_p5 = pnand %p2400_p3, %p2397_p0 }
  0x1f   : > { %2405 = shalt.err (!%p2402_p5)
}
  0x20   : > { %s2406_s13 = scalar_lea.vmem %s185_s29, 2048  ;;  %p2414_p1 = scmp.lt.s32.totalorder %s185_s29, %s185_s29 }
  0x21   : > { %p2407_p7 = scmp.ne.s32.totalorder %s185_s29, %s2406_s13  ;;  %p2415_p4 = scmp.lt.s32.totalorder %s2406_s13, %s2406_s13 }
  0x23   : > { %p2409_p9 = pnand %p2407_p7, %p2395_p12  ;;  %p2416_p8 = por %p2415_p4, %p2414_p1 }
  0x25   : > { %p2410_p6 = pneg %p2409_p9 }
  0x27   : > { %p2417_p2 = pnand %p2416_p8, %p2410_p6 }
  0x29   : > { %2420 = shalt.err (!%p2417_p2)
}
  0x2a   : > { %s2540_s14 = smov 64   ;;  %s2541_s21 = smov 4  }
  0x2b   : > { %2212 = dma.hbm_to_vmem [thread:$0]  (!%p2636_p10), %s3064_s1, 2048, %s185_s29, [#allocation6], %s2540_s14, %s2540_s14, %s2541_s21  }
  0x2c   : > { %p35_p1 = scmp.ge.s32.totalorder %s33_s5, 4  ;;  %s40_s6 = sadd.s32 1, %s2525_s17 }
  0x2d   : > { %p47_p2 = scmp.ne.s32.totalorder %s2525_s17, %s2521_s16  ;;  %p48_p4 = scmp.eq.s32.totalorder %s2537_s20, 0 }
  0x2e   : > { %s3092_s5 = smov (%p35_p1, %s33_s5), 0  ;;  %p3079_p8 = scmp.ne.s32.totalorder %s3073_s24, 0 }
  0x2f   : > { %p2663_p6 = por %p48_p4, %p47_p2  ;;  %s37_s30 = ssub.s32 %s2533_s19, %s3092_s5 }
  0x30   : > { %p2669_p11 = por %p3079_p8, %p47_p2  ;;  %p2222_p12 = scmp.lt.s32.totalorder %s2537_s20, 4 }
  0x31   : > { %p38_p10 = scmp.eq.s32.totalorder %s37_s30, 0  ;;  %s210_s29 = sand.u32 1, %s2525_s17  }
  0x32   : > { %s1752_s9 = sshll.u32 %s210_s29, 9  ;;  %s1912_s11 = sshll.u32 %s2533_s19, 13 }
  0x33   : > { %s2678_s10 = scalar_select %p38_p10, %s2525_s17, %s40_s6  }
  0x34   : > { %s2684_s14 = scalar_lea.hbm %s3063_s0, %s1912_s11  ;;  %s214_s24 = scalar_lea.vmem [#allocation2], %s1752_s9 }
  0x35   : > { %s222_s21 = sshll.u32 %s214_s24, 4  ;;  %p2690_p13 = pnand %p2222_p12, %p2663_p6  ;;  %s2686_s21 = int_to_ptr.vmem [resolvable:$true] %s222_s21 }
  0x36   : > { %s2694_s28 = scalar_lea.sflag [#allocation3], %s210_s29  ;;  %s2421_s6 = scalar_lea.hbm %s2684_s14, 8192 }
  0x37   : > { %p2422_p0 = scmp.ne.s32.totalorder %s2684_s14, %s2421_s6  ;;  %p2423_p3 = pneg %p2690_p13 }
  0x38   : > { %s2426_s7 = scalar_lea.hbm %s3063_s0, 32768  ;;  %p2427_p9 = scmp.lt.u32.totalorder %s2684_s14, %s3063_s0 }
  0x39   : > { %p2424_p5 = pnand %p2423_p3, %p2422_p0  ;;  %p2428_p1 = scmp.lt.u32.totalorder %s2426_s7, %s2421_s6 }
  0x3a   : > { %p2430_p4 = scmp.lt.u32.totalorder %s2421_s6, %s2684_s14 }
  0x3b   : > { %p2425_p7 = pneg %p2424_p5  ;;  %p2429_p2 = por %p2428_p1, %p2427_p9 }
  0x3d   : > { %p2431_p6 = por %p2430_p4, %p2429_p2 }
  0x3f   : > { %p2432_p8 = pnand %p2431_p6, %p2425_p7 }
  0x41   : > { %2435 = shalt.err (!%p2432_p8)
}
  0x42   : > { %s2436_s29 = scalar_lea.vmem %s2686_s21, 8192  ;;  %s2542_s13 = smov [#allocation2]  }
  0x43   : > { %p2437_p12 = scmp.ne.s32.totalorder %s2686_s21, %s2436_s29  ;;  %s2441_s24 = sshll.u32 %s2542_s13, 4  ;;  %s2442_s24 = int_to_ptr.vmem [resolvable:$false] %s2441_s24 }
  0x44   : > { %s2443_s30 = scalar_lea.vmem %s2442_s24, 16384  ;;  %p2444_p5 = scmp.lt.s32.totalorder %s2686_s21, %s2442_s24 }
  0x45   : > { %p2439_p10 = pnand %p2437_p12, %p2423_p3  ;;  %p2445_p9 = scmp.lt.s32.totalorder %s2443_s30, %s2436_s29 }
  0x47   : > { %p2440_p0 = pneg %p2439_p10  ;;  %p2446_p1 = por %p2445_p9, %p2444_p5 }
  0x49   : > { %p2447_p2 = pnand %p2446_p1, %p2440_p0 }
  0x4b   : > { %2450 = shalt.err (!%p2447_p2)
}
  0x4c   : > { %s2543_s6 = smov 128   ;;  %s2544_s9 = smov 8  }
  0x4d   : > { %2216 = dma.hbm_to_vmem [thread:$0]  (!%p2690_p13), %s2684_s14, 8192, %s2686_s21, %s2694_s28, %s2543_s6, %s2543_s6, %s2544_s9  }
  0x4e   : > { %p3082_p3 = scmp.ne.s32.totalorder %s3076_s27, 0 }
  0x4f   : > { %s2725_s7 = sand.u32 (!%p3082_p3), 1, %s2521_s16   ;;  %p3083_p7 = scmp.ne.s32.totalorder (!%p3082_p3), %s3074_s25, 0 }
  0x50   : > { %234 = sbr.rel (%p3082_p3) target bundleno = 514 (0x202), region = 36  ;;  %s1757_s11 = sshll.u32 (!%p3082_p3), %s2725_s7, 9 }
  0x51   : > { %s237_s12 = scalar_lea.sflag (!%p3082_p3), [#allocation3], %s2725_s7  ;;  %s2729_s29 = scalar_lea.vmem (!%p3082_p3), [#allocation2], %s1757_s11 }
  0x57   : > { %2504 = dma.done.wait (%p3083_p7), %s237_s12, 8192  }
  0x58   : > { %2506 = vsyncadd (%p3083_p7), %s237_s12, 4294959104  ;;  %p3084_p13 = scmp.ne.s32.totalorder %s3072_s23, 0 }
  0x5a   : > { %2508 = dma.done.wait (%p3084_p13), [#allocation6], 2048  }
  0x5b   : > { %2510 = vsyncadd (%p3084_p13), [#allocation6], 4294965248  ;;  %v2545_v0 = vmov 0   ;;  %v2281_v1 = vld [vmem:[#allocation5] sm:$0xff]   ;;  %v2282_v2 = vld [vmem:[#allocation5 + $0x8] sm:$0xff]   ;;  %s1759_s21 = sshll.u32 %s2725_s7, 8 }
  0x5c   : > { %796 = vmatprep.subr.bf16.mxu0 %v2545_v0  ;;  %2169 = vmatprep.subr.bf16.mxu1 %v2545_v0  ;;  %v2283_v3 = vld [vmem:[#allocation5 + $0x10] sm:$0xff]   ;;  %v2284_v4 = vld [vmem:[#allocation5 + $0x18] sm:$0xff]   ;;  %v2285_v5 = vld [vmem:[#allocation5 + $0x20] sm:$0xff]   ;;  %s2856_s22 = scalar_lea.vmem [#allocation7], %s1759_s21  ;;  %s1977_s28 = sshll.u32 %s2529_s18, 12 }
  0x5d   : > { %797 = vmatpush1.bf16.msra.mxu0 %v2281_v1  ;;  %2185 = vmatpush1.bf16.msra.mxu1 %v2281_v1  ;;  %v2299_v6 = vld [vmem:[%s2729_s29 + $0x4] ss:$8 sps:$4 sm:$0xff]   ;;  %v2287_v9 = vld [vmem:[#allocation5 + $0x30] sm:$0xff]   ;;  %v2288_v10 = vld [vmem:[#allocation5 + $0x38] sm:$0xff]   ;;  %s1626_s13 = sshll.u32 %s2856_s22, 4  ;;  %s3011_s6 = scalar_lea.hbm %s3067_s4, %s1977_s28  ;;  %s3013_s13 = int_to_ptr.vmem [resolvable:$true] %s1626_s13 }
  0x5e   : > { %798 = vmatprep.subr.bf16.mxu0 %v2545_v0  ;;  %2170 = vmatprep.subr.bf16.mxu1 %v2545_v0  ;;  %v2286_v7 = vld [vmem:[#allocation5 + $0x28] sm:$0xff]   ;;  %v2289_v11 = vld [vmem:[#allocation5 + $0x40] sm:$0xff]   ;;  %v2291_v13 = vld [vmem:[#allocation5 + $0x50] sm:$0xff]   ;;  %s1612_s18 = scalar_lea.sflag [#allocation4], %s2725_s7  ;;  %s2451_s9 = scalar_lea.vmem %s3013_s13, 4096 }
  0x5f   : > { %v2302_v8 = vld [vmem:[%s2729_s29 + $0x104] ss:$8 sps:$4 sm:$0xff]   ;;  %828 = vmatprep.mubr.bf16.mxu0 %v2299_v6  ;;  %v2292_v14 = vld [vmem:[#allocation5 + $0x58] sm:$0xff]   ;;  %v2295_v17 = vld [vmem:[#allocation5 + $0x70] sm:$0xff]   ;;  %p2452_p4 = scmp.ne.s32.totalorder %s3013_s13, %s2451_s9  ;;  %s2546_s11 = smov [#allocation7]  }
  0x60   : > { %956 = vmatprep.mubr.bf16.mxu1 %v2302_v8  ;;  %v2290_v12 = vld [vmem:[#allocation5 + $0x48] sm:$0xff]   ;;  %v2293_v15 = vld [vmem:[#allocation5 + $0x60] sm:$0xff]   ;;  %v2296_v18 = vld [vmem:[#allocation5 + $0x78] sm:$0xff]   ;;  %s2455_s12 = sshll.u32 %s2546_s11, 4  ;;  %s2456_s12 = int_to_ptr.vmem [resolvable:$false] %s2455_s12 }
  0x61   : > { %799 = vmatpush1.bf16.msra.mxu0 %v2282_v2  ;;  %2186 = vmatpush1.bf16.msra.mxu1 %v2282_v2  ;;  %v2294_v16 = vld [vmem:[#allocation5 + $0x68] sm:$0xff]   ;;  %v2303_v21 = vld [vmem:[%s2729_s29 + $0x14] ss:$8 sps:$4 sm:$0xff]   ;;  %v2307_v23 = vld [vmem:[%s2729_s29 + $0x10] ss:$8 sps:$4 sm:$0xff]   ;;  %p2453_p6 = pnand %p2452_p4, %p2669_p11  ;;  %p2458_p12 = scmp.lt.s32.totalorder %s3013_s13, %s2456_s12 }
  0x62   : > { %800 = vmatprep.subr.bf16.mxu0 %v2545_v0  ;;  %2171 = vmatprep.subr.bf16.mxu1 %v2545_v0  ;;  %v2297_v19 = vld [vmem:[%s2729_s29] ss:$8 sps:$4 sm:$0xff]   ;;  %v2305_v22 = vld [vmem:[%s2729_s29 + $0x114] ss:$8 sps:$4 sm:$0xff]   ;;  %v2308_v24 = vld [vmem:[%s2729_s29 + $0x110] ss:$8 sps:$4 sm:$0xff]  }
  0x63   : > { %v2300_v20 = vld [vmem:[%s2729_s29 + $0x100] ss:$8 sps:$4 sm:$0xff]   ;;  %v2309_v25 = vld [vmem:[%s2729_s29 + $0x24] ss:$8 sps:$4 sm:$0xff]   ;;  %v2315_v29 = vld [vmem:[%s2729_s29 + $0x34] ss:$8 sps:$4 sm:$0xff]   ;;  %p2454_p8 = pneg %p2453_p6 }
  0x64   : > { %v2311_v26 = vld [vmem:[%s2729_s29 + $0x124] ss:$8 sps:$4 sm:$0xff]   ;;  %v2313_v27 = vld [vmem:[%s2729_s29 + $0x20] ss:$8 sps:$4 sm:$0xff]   ;;  %v2317_v30 = vld [vmem:[%s2729_s29 + $0x134] ss:$8 sps:$4 sm:$0xff]  }
  0x65   : > { %801 = vmatpush1.bf16.msra.mxu0 %v2283_v3  ;;  %2187 = vmatpush1.bf16.msra.mxu1 %v2283_v3  ;;  %v2314_v28 = vld [vmem:[%s2729_s29 + $0x120] ss:$8 sps:$4 sm:$0xff]   ;;  %v2319_v31 = vld [vmem:[%s2729_s29 + $0x30] ss:$8 sps:$4 sm:$0xff]   ;;  %v2321_v33 = vld [vmem:[%s2729_s29 + $0x44] ss:$8 sps:$4 sm:$0xff]  }
  0x66   : > { %802 = vmatprep.subr.bf16.mxu0 %v2545_v0  ;;  %2172 = vmatprep.subr.bf16.mxu1 %v2545_v0  ;;  %v2320_v32 = vld [vmem:[%s2729_s29 + $0x130] ss:$8 sps:$4 sm:$0xff]   ;;  %v2323_v34 = vld [vmem:[%s2729_s29 + $0x144] ss:$8 sps:$4 sm:$0xff]   ;;  %v2325_v35 = vld [vmem:[%s2729_s29 + $0x40] ss:$8 sps:$4 sm:$0xff]  }
  0x67   : > { %v2326_v36 = vld [vmem:[%s2729_s29 + $0x140] ss:$8 sps:$4 sm:$0xff]   ;;  %v2327_v37 = vld [vmem:[%s2729_s29 + $0x54] ss:$8 sps:$4 sm:$0xff]   ;;  %v2331_v39 = vld [vmem:[%s2729_s29 + $0x50] ss:$8 sps:$4 sm:$0xff]  }
  0x68   : > { %v2329_v38 = vld [vmem:[%s2729_s29 + $0x154] ss:$8 sps:$4 sm:$0xff]   ;;  %v2332_v40 = vld [vmem:[%s2729_s29 + $0x150] ss:$8 sps:$4 sm:$0xff]   ;;  %v2333_v41 = vld [vmem:[%s2729_s29 + $0x64] ss:$8 sps:$4 sm:$0xff]  }
  0x69   : > { %803 = vmatpush1.bf16.msra.mxu0 %v2284_v4  ;;  %2188 = vmatpush1.bf16.msra.mxu1 %v2284_v4  ;;  %v2335_v42 = vld [vmem:[%s2729_s29 + $0x164] ss:$8 sps:$4 sm:$0xff]   ;;  %v2337_v43 = vld [vmem:[%s2729_s29 + $0x60] ss:$8 sps:$4 sm:$0xff]   ;;  %v2339_v45 = vld [vmem:[%s2729_s29 + $0x74] ss:$8 sps:$4 sm:$0xff]  }
  0x6a   : > { %804 = vmatprep.subr.bf16.mxu0 %v2545_v0  ;;  %2173 = vmatprep.subr.bf16.mxu1 %v2545_v0  ;;  %v2338_v44 = vld [vmem:[%s2729_s29 + $0x160] ss:$8 sps:$4 sm:$0xff]   ;;  %v2341_v46 = vld [vmem:[%s2729_s29 + $0x174] ss:$8 sps:$4 sm:$0xff]   ;;  %v2343_v47 = vld [vmem:[%s2729_s29 + $0x70] ss:$8 sps:$4 sm:$0xff]  }
  0x6b   : > { %v2344_v48 = vld [vmem:[%s2729_s29 + $0x170] ss:$8 sps:$4 sm:$0xff]   ;;  %v2345_v49 = vld [vmem:[%s2729_s29 + $0x84] ss:$8 sps:$4 sm:$0xff]   ;;  %v2349_v51 = vld [vmem:[%s2729_s29 + $0x80] ss:$8 sps:$4 sm:$0xff]  }
  0x6c   : > { %v2347_v50 = vld [vmem:[%s2729_s29 + $0x184] ss:$8 sps:$4 sm:$0xff]   ;;  %v2350_v52 = vld [vmem:[%s2729_s29 + $0x180] ss:$8 sps:$4 sm:$0xff]   ;;  %v2351_v53 = vld [vmem:[%s2729_s29 + $0x94] ss:$8 sps:$4 sm:$0xff]  }
  0x6d   : > { %805 = vmatpush1.bf16.msra.mxu0 %v2285_v5  ;;  %2189 = vmatpush1.bf16.msra.mxu1 %v2285_v5  ;;  %v2353_v54 = vld [vmem:[%s2729_s29 + $0x194] ss:$8 sps:$4 sm:$0xff]   ;;  %v2355_v55 = vld [vmem:[%s2729_s29 + $0x90] ss:$8 sps:$4 sm:$0xff]   ;;  %v2357_v57 = vld [vmem:[%s2729_s29 + $0xa4] ss:$8 sps:$4 sm:$0xff]  }
  0x6e   : > { %806 = vmatprep.subr.bf16.mxu0 %v2545_v0  ;;  %2174 = vmatprep.subr.bf16.mxu1 %v2545_v0  ;;  %v2356_v56 = vld [vmem:[%s2729_s29 + $0x190] ss:$8 sps:$4 sm:$0xff]   ;;  %v2359_v58 = vld [vmem:[%s2729_s29 + $0x1a4] ss:$8 sps:$4 sm:$0xff]   ;;  %v2361_v59 = vld [vmem:[%s2729_s29 + $0xa0] ss:$8 sps:$4 sm:$0xff]  }
  0x6f   : > { %v2362_v60 = vld [vmem:[%s2729_s29 + $0x1a0] ss:$8 sps:$4 sm:$0xff]   ;;  %v2363_v61 = vld [vmem:[%s2729_s29 + $0xb4] ss:$8 sps:$4 sm:$0xff]   ;;  %v2367_v63 = vld [vmem:[%s2729_s29 + $0xb0] ss:$8 sps:$4 sm:$0xff]  }
  0x70   : > { %v2365_v62 = vld [vmem:[%s2729_s29 + $0x1b4] ss:$8 sps:$4 sm:$0xff]   ;;  %v2369_v1 = vld [vmem:[%s2729_s29 + $0xc4] ss:$8 sps:$4 sm:$0xff]   ;;  %v2373_v3 = vld [vmem:[%s2729_s29 + $0xc0] ss:$8 sps:$4 sm:$0xff]  }
  0x71   : > { %807 = vmatpush1.bf16.msra.mxu0 %v2286_v7  ;;  %2190 = vmatpush1.bf16.msra.mxu1 %v2286_v7  ;;  %v2371_v2 = vld [vmem:[%s2729_s29 + $0x1c4] ss:$8 sps:$4 sm:$0xff]   ;;  %v2374_v4 = vld [vmem:[%s2729_s29 + $0x1c0] ss:$8 sps:$4 sm:$0xff]   ;;  %v2375_v5 = vld [vmem:[%s2729_s29 + $0xd4] ss:$8 sps:$4 sm:$0xff]  }
  0x72   : > { %808 = vmatprep.subr.bf16.mxu0 %v2545_v0  ;;  %2175 = vmatprep.subr.bf16.mxu1 %v2545_v0  ;;  %v2377_v6 = vld [vmem:[%s2729_s29 + $0x1d4] ss:$8 sps:$4 sm:$0xff]   ;;  %v2379_v7 = vld [vmem:[%s2729_s29 + $0xd0] ss:$8 sps:$4 sm:$0xff]  }
  0x73   : > { %v2380_v8 = vld [vmem:[%s2729_s29 + $0x1d0] ss:$8 sps:$4 sm:$0xff]  }
  0x75   : > { %809 = vmatpush1.bf16.msra.mxu0 %v2287_v9  ;;  %2191 = vmatpush1.bf16.msra.mxu1 %v2287_v9  ;;  %v2381_v9 = vld [vmem:[%s2729_s29 + $0xe4] ss:$8 sps:$4 sm:$0xff]  }
  0x76   : > { %810 = vmatprep.subr.bf16.mxu0 %v2545_v0  ;;  %2176 = vmatprep.subr.bf16.mxu1 %v2545_v0 }
  0x79   : > { %811 = vmatpush1.bf16.msra.mxu0 %v2288_v10  ;;  %2192 = vmatpush1.bf16.msra.mxu1 %v2288_v10  ;;  %v2383_v10 = vld [vmem:[%s2729_s29 + $0x1e4] ss:$8 sps:$4 sm:$0xff]  }
  0x7a   : > { %812 = vmatprep.subr.bf16.mxu0 %v2545_v0  ;;  %2177 = vmatprep.subr.bf16.mxu1 %v2545_v0 }
  0x7d   : > { %813 = vmatpush1.bf16.msra.mxu0 %v2289_v11  ;;  %2193 = vmatpush1.bf16.msra.mxu1 %v2289_v11  ;;  %v2385_v11 = vld [vmem:[%s2729_s29 + $0xe0] ss:$8 sps:$4 sm:$0xff]  }
  0x7e   : > { %814 = vmatprep.subr.bf16.mxu0 %v2545_v0  ;;  %2178 = vmatprep.subr.bf16.mxu1 %v2545_v0 }
  0x81   : > { %815 = vmatpush1.bf16.msra.mxu0 %v2290_v12  ;;  %2194 = vmatpush1.bf16.msra.mxu1 %v2290_v12  ;;  %v2386_v12 = vld [vmem:[%s2729_s29 + $0x1e0] ss:$8 sps:$4 sm:$0xff]  }
  0x82   : > { %816 = vmatprep.subr.bf16.mxu0 %v2545_v0  ;;  %2179 = vmatprep.subr.bf16.mxu1 %v2545_v0 }
  0x85   : > { %817 = vmatpush1.bf16.msra.mxu0 %v2291_v13  ;;  %2195 = vmatpush1.bf16.msra.mxu1 %v2291_v13  ;;  %v2387_v13 = vld [vmem:[%s2729_s29 + $0xf4] ss:$8 sps:$4 sm:$0xff]  }
  0x86   : > { %818 = vmatprep.subr.bf16.mxu0 %v2545_v0  ;;  %2180 = vmatprep.subr.bf16.mxu1 %v2545_v0 }
  0x89   : > { %819 = vmatpush1.bf16.msra.mxu0 %v2292_v14  ;;  %2196 = vmatpush1.bf16.msra.mxu1 %v2292_v14  ;;  %v2389_v14 = vld [vmem:[%s2729_s29 + $0x1f4] ss:$8 sps:$4 sm:$0xff]  }
  0x8a   : > { %820 = vmatprep.subr.bf16.mxu0 %v2545_v0  ;;  %2181 = vmatprep.subr.bf16.mxu1 %v2545_v0 }
  0x8d   : > { %821 = vmatpush1.bf16.msra.mxu0 %v2293_v15  ;;  %2197 = vmatpush1.bf16.msra.mxu1 %v2293_v15  ;;  %v2391_v15 = vld [vmem:[%s2729_s29 + $0xf0] ss:$8 sps:$4 sm:$0xff]  }
  0x8e   : > { %822 = vmatprep.subr.bf16.mxu0 %v2545_v0  ;;  %2182 = vmatprep.subr.bf16.mxu1 %v2545_v0 }
  0x91   : > { %823 = vmatpush1.bf16.msra.mxu0 %v2294_v16  ;;  %2198 = vmatpush1.bf16.msra.mxu1 %v2294_v16  ;;  %v2392_v16 = vld [vmem:[%s2729_s29 + $0x1f0] ss:$8 sps:$4 sm:$0xff]  }
  0x92   : > { %824 = vmatprep.subr.bf16.mxu0 %v2545_v0  ;;  %2183 = vmatprep.subr.bf16.mxu1 %v2545_v0 }
  0x95   : > { %825 = vmatpush1.bf16.msra.mxu0 %v2295_v17  ;;  %2199 = vmatpush1.bf16.msra.mxu1 %v2295_v17  ;;  %v2838_v17 = vld [vmem:[%s3065_s2] ss:$0 sm:$0xff] }
  0x96   : > { %826 = vmatprep.subr.bf16.mxu0 %v2545_v0  ;;  %2184 = vmatprep.subr.bf16.mxu1 %v2545_v0  ;;  %v2368_v0 = vld [vmem:[%s2729_s29 + $0x1b0] ss:$8 sps:$4 sm:$0xff]   ;;  %s2457_s29 = scalar_lea.vmem %s2456_s12, 8192 }
  0x97   : > { %p2459_p10 = scmp.lt.s32.totalorder %s2457_s29, %s2451_s9 }
  0x99   : > { %827 = vmatpush1.bf16.msra.mxu0 %v2296_v18  ;;  %2200 = vmatpush1.bf16.msra.mxu1 %v2296_v18  ;;  %p2460_p0 = por %p2459_p10, %p2458_p12 }
  0x9b   : > { %p2461_p5 = pnand %p2460_p0, %p2454_p8 }
  0x9c   : > { %829 = vmatmul.mubr.bf16.vlgmr.msra.gmra.mrb[0].mxu0 %v2297_v19  ;;  %957 = vmatmul.mubr.bf16.vlgmr.msra.gmra.mrb[0].mxu1 %v2300_v20  ;;  %v2843_v19 = vld [vmem:[%s3066_s3] ss:$0 sm:$0xff] }
  0x9d   : > { %836 = vmatprep.mubr.bf16.mxu0 %v2303_v21  ;;  %964 = vmatprep.mubr.bf16.mxu1 %v2305_v22 }
  0xa4   : > { %837 = vmatmul.mubr.bf16.gmra.mrb[4].mxu0 %v2307_v23  ;;  %965 = vmatmul.mubr.bf16.gmra.mrb[4].mxu1 %v2308_v24 }
  0xa5   : > { %844 = vmatprep.mubr.bf16.mxu0 %v2309_v25  ;;  %972 = vmatprep.mubr.bf16.mxu1 %v2311_v26 }
  0xac   : > { %845 = vmatmul.mubr.bf16.gmra.mrb[8].mxu0 %v2313_v27  ;;  %973 = vmatmul.mubr.bf16.gmra.mrb[8].mxu1 %v2314_v28 }
  0xad   : > { %852 = vmatprep.mubr.bf16.mxu0 %v2315_v29  ;;  %980 = vmatprep.mubr.bf16.mxu1 %v2317_v30 }
  0xb4   : > { %853 = vmatmul.mubr.bf16.gmra.mrb[12].mxu0 %v2319_v31  ;;  %981 = vmatmul.mubr.bf16.gmra.mrb[12].mxu1 %v2320_v32 }
  0xb5   : > { %860 = vmatprep.mubr.bf16.mxu0 %v2321_v33  ;;  %988 = vmatprep.mubr.bf16.mxu1 %v2323_v34 }
  0xbc   : > { %861 = vmatmul.mubr.bf16.gmra.mrb[16].mxu0 %v2325_v35  ;;  %989 = vmatmul.mubr.bf16.gmra.mrb[16].mxu1 %v2326_v36 }
  0xbd   : > { %868 = vmatprep.mubr.bf16.mxu0 %v2327_v37  ;;  %996 = vmatprep.mubr.bf16.mxu1 %v2329_v38 }
  0xc4   : > { %869 = vmatmul.mubr.bf16.gmra.mrb[20].mxu0 %v2331_v39  ;;  %997 = vmatmul.mubr.bf16.gmra.mrb[20].mxu1 %v2332_v40 }
  0xc5   : > { %876 = vmatprep.mubr.bf16.mxu0 %v2333_v41  ;;  %1004 = vmatprep.mubr.bf16.mxu1 %v2335_v42 }
  0xcc   : > { %877 = vmatmul.mubr.bf16.gmra.mrb[24].mxu0 %v2337_v43  ;;  %1005 = vmatmul.mubr.bf16.gmra.mrb[24].mxu1 %v2338_v44 }
  0xcd   : > { %884 = vmatprep.mubr.bf16.mxu0 %v2339_v45  ;;  %1012 = vmatprep.mubr.bf16.mxu1 %v2341_v46 }
  0xd4   : > { %885 = vmatmul.mubr.bf16.gmra.mrb[28].mxu0 %v2343_v47  ;;  %1013 = vmatmul.mubr.bf16.gmra.mrb[28].mxu1 %v2344_v48 }
  0xd5   : > { %892 = vmatprep.mubr.bf16.mxu0 %v2345_v49  ;;  %1020 = vmatprep.mubr.bf16.mxu1 %v2347_v50 }
  0xdc   : > { %893 = vmatmul.mubr.bf16.gmra.mrb[32].mxu0 %v2349_v51  ;;  %1021 = vmatmul.mubr.bf16.gmra.mrb[32].mxu1 %v2350_v52 }
  0xdd   : > { %900 = vmatprep.mubr.bf16.mxu0 %v2351_v53  ;;  %1028 = vmatprep.mubr.bf16.mxu1 %v2353_v54 }
  0xe4   : > { %901 = vmatmul.mubr.bf16.gmra.mrb[36].mxu0 %v2355_v55  ;;  %1029 = vmatmul.mubr.bf16.gmra.mrb[36].mxu1 %v2356_v56 }
  0xe5   : > { %908 = vmatprep.mubr.bf16.mxu0 %v2357_v57  ;;  %1036 = vmatprep.mubr.bf16.mxu1 %v2359_v58 }
  0xec   : > { %909 = vmatmul.mubr.bf16.gmra.mrb[40].mxu0 %v2361_v59  ;;  %1037 = vmatmul.mubr.bf16.gmra.mrb[40].mxu1 %v2362_v60 }
  0xed   : > { %916 = vmatprep.mubr.bf16.mxu0 %v2363_v61  ;;  %1044 = vmatprep.mubr.bf16.mxu1 %v2365_v62 }
  0xf4   : > { %917 = vmatmul.mubr.bf16.gmra.mrb[44].mxu0 %v2367_v63  ;;  %1045 = vmatmul.mubr.bf16.gmra.mrb[44].mxu1 %v2368_v0 }
  0xf5   : > { %924 = vmatprep.mubr.bf16.mxu0 %v2369_v1  ;;  %1052 = vmatprep.mubr.bf16.mxu1 %v2371_v2 }
  0xfc   : > { %925 = vmatmul.mubr.bf16.gmra.mrb[48].mxu0 %v2373_v3  ;;  %1053 = vmatmul.mubr.bf16.gmra.mrb[48].mxu1 %v2374_v4 }
  0xfd   : > { %932 = vmatprep.mubr.bf16.mxu0 %v2375_v5  ;;  %1060 = vmatprep.mubr.bf16.mxu1 %v2377_v6 }
 0x104   : > { %933 = vmatmul.mubr.bf16.gmra.mrb[52].mxu0 %v2379_v7  ;;  %1061 = vmatmul.mubr.bf16.gmra.mrb[52].mxu1 %v2380_v8 }
 0x105   : > { %940 = vmatprep.mubr.bf16.mxu0 %v2381_v9  ;;  %1068 = vmatprep.mubr.bf16.mxu1 %v2383_v10 }
 0x10c   : > { %941 = vmatmul.mubr.bf16.gmra.mrb[56].mxu0 %v2385_v11  ;;  %1069 = vmatmul.mubr.bf16.gmra.mrb[56].mxu1 %v2386_v12 }
 0x10d   : > { %948 = vmatprep.mubr.bf16.mxu0 %v2387_v13  ;;  %1076 = vmatprep.mubr.bf16.mxu1 %v2389_v14 }
 0x114   : > { %949 = vmatmul.mubr.bf16.gmra.mrb[60].mxu0 %v2391_v15  ;;  %1077 = vmatmul.mubr.bf16.gmra.mrb[60].mxu1 %v2392_v16 }
 0x16f   : > { %v830_v18 = vpop.f32.mrb[0].mxu0  ;;  %v958_v20 = vpop.f32.mrb[0].mxu1 }
 0x170   : > { %v1092_v21 = vmul.f32 %v2838_v17, %v830_v18  ;;  %v1124_v22 = vmul.f32 %v2838_v17, %v958_v20  ;;  %v832_v23 = vpop.f32.mrb[1].mxu0  ;;  %v960_v24 = vpop.f32.mrb[1].mxu1 }
 0x171   : > { %v833_v25 = vpop.f32.mrb[2].mxu0  ;;  %v961_v26 = vpop.f32.mrb[2].mxu1 }
 0x172   : > { %v1163_v27 = vadd.f32 %v2843_v19, %v1092_v21  ;;  %v1195_v28 = vadd.f32 %v2843_v19, %v1124_v22  ;;  %v1093_v29 = vmul.f32 %v2838_v17, %v833_v25  ;;  %v1125_v30 = vmul.f32 %v2838_v17, %v961_v26  ;;  %v835_v31 = vpop.f32.mrb[3].mxu0  ;;  %v963_v32 = vpop.f32.mrb[3].mxu1 }
 0x174   : > { %v1164_v33 = vadd.f32 %v2843_v19, %v1093_v29  ;;  %v1196_v34 = vadd.f32 %v2843_v19, %v1125_v30  ;;  %v1227_v35 = vmax.f32 %v1163_v27, 0.0  ;;  %v1259_v36 = vmax.f32 %v1195_v28, 0.0 }
 0x176   : > { %v1228_v37 = vmax.f32 %v1164_v33, 0.0  ;;  %v1260_v38 = vmax.f32 %v1196_v34, 0.0 }
 0x177   : > { %v838_v39 = vpop.f32.mrb[4].mxu0  ;;  %v966_v40 = vpop.f32.mrb[4].mxu1 }
 0x178   : > { %v1981_v41 = vpack.c.bf16 %v1228_v37, %v1227_v35  ;;  %v2061_v42 = vpack.c.bf16 %v1260_v38, %v1259_v36  ;;  %v1094_v43 = vmul.f32 %v2838_v17, %v838_v39  ;;  %v1126_v44 = vmul.f32 %v2838_v17, %v966_v40  ;;  %v840_v45 = vpop.f32.mrb[5].mxu0  ;;  %v968_v46 = vpop.f32.mrb[5].mxu1 }
 0x179   : > { %v841_v47 = vpop.f32.mrb[6].mxu0  ;;  %v969_v48 = vpop.f32.mrb[6].mxu1 }
 0x17a   : > { %1982 = vst [vmem:[%s2856_s22] sm:$0xff] %v1981_v41   ;;  %2153 = vst [vmem:[%s2856_s22 + $0x80] sm:$0xff] %v2061_v42   ;;  %v1165_v49 = vadd.f32 %v2843_v19, %v1094_v43  ;;  %v1197_v50 = vadd.f32 %v2843_v19, %v1126_v44  ;;  %v1095_v51 = vmul.f32 %v2838_v17, %v841_v47  ;;  %v843_v53 = vpop.f32.mrb[7].mxu0  ;;  %v971_v54 = vpop.f32.mrb[7].mxu1 }
 0x17b   : > { %v1127_v52 = vmul.f32 %v2838_v17, %v969_v48 }
 0x17c   : > { %v1166_v55 = vadd.f32 %v2843_v19, %v1095_v51  ;;  %v1229_v57 = vmax.f32 %v1165_v49, 0.0  ;;  %v1261_v58 = vmax.f32 %v1197_v50, 0.0 }
 0x17d   : > { %v1198_v56 = vadd.f32 %v2843_v19, %v1127_v52 }
 0x17e   : > { %v1230_v59 = vmax.f32 %v1166_v55, 0.0 }
 0x17f   : > { %v1262_v60 = vmax.f32 %v1198_v56, 0.0  ;;  %v846_v61 = vpop.f32.mrb[8].mxu0  ;;  %v974_v62 = vpop.f32.mrb[8].mxu1 }
 0x180   : > { %v1986_v63 = vpack.c.bf16 %v1230_v59, %v1229_v57  ;;  %v1096_v1 = vmul.f32 %v2838_v17, %v846_v61  ;;  %v1128_v2 = vmul.f32 %v2838_v17, %v974_v62  ;;  %v848_v3 = vpop.f32.mrb[9].mxu0  ;;  %v976_v4 = vpop.f32.mrb[9].mxu1 }
 0x181   : > { %v2066_v0 = vpack.c.bf16 %v1262_v60, %v1261_v58  ;;  %v849_v5 = vpop.f32.mrb[10].mxu0  ;;  %v977_v6 = vpop.f32.mrb[10].mxu1 }
 0x182   : > { %2138 = vst [vmem:[%s2856_s22 + $0x8] sm:$0xff] %v1986_v63   ;;  %v1167_v7 = vadd.f32 %v2843_v19, %v1096_v1  ;;  %v1199_v8 = vadd.f32 %v2843_v19, %v1128_v2  ;;  %v1097_v9 = vmul.f32 %v2838_v17, %v849_v5  ;;  %v1129_v10 = vmul.f32 %v2838_v17, %v977_v6  ;;  %v851_v11 = vpop.f32.mrb[11].mxu0  ;;  %v979_v12 = vpop.f32.mrb[11].mxu1 }
 0x183   : > { %2154 = vst [vmem:[%s2856_s22 + $0x88] sm:$0xff] %v2066_v0  }
 0x184   : > { %v1168_v13 = vadd.f32 %v2843_v19, %v1097_v9  ;;  %v1200_v14 = vadd.f32 %v2843_v19, %v1129_v10  ;;  %v1231_v15 = vmax.f32 %v1167_v7, 0.0  ;;  %v1263_v16 = vmax.f32 %v1199_v8, 0.0 }
 0x186   : > { %v1232_v18 = vmax.f32 %v1168_v13, 0.0  ;;  %v1264_v20 = vmax.f32 %v1200_v14, 0.0 }
 0x187   : > { %v854_v21 = vpop.f32.mrb[12].mxu0  ;;  %v982_v22 = vpop.f32.mrb[12].mxu1 }
 0x188   : > { %v1991_v23 = vpack.c.bf16 %v1232_v18, %v1231_v15  ;;  %v2071_v24 = vpack.c.bf16 %v1264_v20, %v1263_v16  ;;  %v1098_v25 = vmul.f32 %v2838_v17, %v854_v21  ;;  %v1130_v26 = vmul.f32 %v2838_v17, %v982_v22  ;;  %v856_v27 = vpop.f32.mrb[13].mxu0  ;;  %v984_v28 = vpop.f32.mrb[13].mxu1 }
 0x189   : > { %v857_v29 = vpop.f32.mrb[14].mxu0  ;;  %v985_v30 = vpop.f32.mrb[14].mxu1 }
 0x18a   : > { %2139 = vst [vmem:[%s2856_s22 + $0x10] sm:$0xff] %v1991_v23   ;;  %2155 = vst [vmem:[%s2856_s22 + $0x90] sm:$0xff] %v2071_v24   ;;  %v1169_v31 = vadd.f32 %v2843_v19, %v1098_v25  ;;  %v1201_v32 = vadd.f32 %v2843_v19, %v1130_v26  ;;  %v1099_v33 = vmul.f32 %v2838_v17, %v857_v29  ;;  %v859_v35 = vpop.f32.mrb[15].mxu0  ;;  %v987_v36 = vpop.f32.mrb[15].mxu1 }
 0x18b   : > { %v1131_v34 = vmul.f32 %v2838_v17, %v985_v30 }
 0x18c   : > { %v1170_v37 = vadd.f32 %v2843_v19, %v1099_v33  ;;  %v1233_v39 = vmax.f32 %v1169_v31, 0.0  ;;  %v1265_v40 = vmax.f32 %v1201_v32, 0.0 }
 0x18d   : > { %v1202_v38 = vadd.f32 %v2843_v19, %v1131_v34 }
 0x18e   : > { %v1234_v41 = vmax.f32 %v1170_v37, 0.0 }
 0x18f   : > { %v1266_v42 = vmax.f32 %v1202_v38, 0.0  ;;  %v862_v43 = vpop.f32.mrb[16].mxu0  ;;  %v990_v44 = vpop.f32.mrb[16].mxu1 }
 0x190   : > { %v1996_v45 = vpack.c.bf16 %v1234_v41, %v1233_v39  ;;  %v1100_v47 = vmul.f32 %v2838_v17, %v862_v43  ;;  %v1132_v48 = vmul.f32 %v2838_v17, %v990_v44  ;;  %v864_v49 = vpop.f32.mrb[17].mxu0  ;;  %v992_v50 = vpop.f32.mrb[17].mxu1 }
 0x191   : > { %v2076_v46 = vpack.c.bf16 %v1266_v42, %v1265_v40  ;;  %v865_v51 = vpop.f32.mrb[18].mxu0  ;;  %v993_v52 = vpop.f32.mrb[18].mxu1 }
 0x192   : > { %2140 = vst [vmem:[%s2856_s22 + $0x18] sm:$0xff] %v1996_v45   ;;  %v1171_v53 = vadd.f32 %v2843_v19, %v1100_v47  ;;  %v1203_v54 = vadd.f32 %v2843_v19, %v1132_v48  ;;  %v1101_v55 = vmul.f32 %v2838_v17, %v865_v51  ;;  %v1133_v56 = vmul.f32 %v2838_v17, %v993_v52  ;;  %v867_v57 = vpop.f32.mrb[19].mxu0  ;;  %v995_v58 = vpop.f32.mrb[19].mxu1 }
 0x193   : > { %2156 = vst [vmem:[%s2856_s22 + $0x98] sm:$0xff] %v2076_v46  }
 0x194   : > { %v1172_v59 = vadd.f32 %v2843_v19, %v1101_v55  ;;  %v1204_v60 = vadd.f32 %v2843_v19, %v1133_v56  ;;  %v1235_v61 = vmax.f32 %v1171_v53, 0.0  ;;  %v1267_v62 = vmax.f32 %v1203_v54, 0.0 }
 0x196   : > { %v1236_v63 = vmax.f32 %v1172_v59, 0.0  ;;  %v1268_v0 = vmax.f32 %v1204_v60, 0.0 }
 0x197   : > { %v870_v1 = vpop.f32.mrb[20].mxu0  ;;  %v998_v2 = vpop.f32.mrb[20].mxu1 }
 0x198   : > { %v2001_v3 = vpack.c.bf16 %v1236_v63, %v1235_v61  ;;  %v2081_v4 = vpack.c.bf16 %v1268_v0, %v1267_v62  ;;  %v1102_v5 = vmul.f32 %v2838_v17, %v870_v1  ;;  %v1134_v6 = vmul.f32 %v2838_v17, %v998_v2  ;;  %v872_v7 = vpop.f32.mrb[21].mxu0  ;;  %v1000_v8 = vpop.f32.mrb[21].mxu1 }
 0x199   : > { %v873_v9 = vpop.f32.mrb[22].mxu0  ;;  %v1001_v10 = vpop.f32.mrb[22].mxu1 }
 0x19a   : > { %2141 = vst [vmem:[%s2856_s22 + $0x20] sm:$0xff] %v2001_v3   ;;  %2157 = vst [vmem:[%s2856_s22 + $0xa0] sm:$0xff] %v2081_v4   ;;  %v1173_v11 = vadd.f32 %v2843_v19, %v1102_v5  ;;  %v1205_v12 = vadd.f32 %v2843_v19, %v1134_v6  ;;  %v1103_v13 = vmul.f32 %v2838_v17, %v873_v9  ;;  %v875_v15 = vpop.f32.mrb[23].mxu0  ;;  %v1003_v16 = vpop.f32.mrb[23].mxu1 }
 0x19b   : > { %v1135_v14 = vmul.f32 %v2838_v17, %v1001_v10 }
 0x19c   : > { %v1174_v18 = vadd.f32 %v2843_v19, %v1103_v13  ;;  %v1237_v21 = vmax.f32 %v1173_v11, 0.0  ;;  %v1269_v22 = vmax.f32 %v1205_v12, 0.0 }
 0x19d   : > { %v1206_v20 = vadd.f32 %v2843_v19, %v1135_v14 }
 0x19e   : > { %v1238_v23 = vmax.f32 %v1174_v18, 0.0 }
 0x19f   : > { %v1270_v24 = vmax.f32 %v1206_v20, 0.0  ;;  %v878_v25 = vpop.f32.mrb[24].mxu0  ;;  %v1006_v26 = vpop.f32.mrb[24].mxu1 }
 0x1a0   : > { %v2006_v27 = vpack.c.bf16 %v1238_v23, %v1237_v21  ;;  %v1104_v29 = vmul.f32 %v2838_v17, %v878_v25  ;;  %v1136_v30 = vmul.f32 %v2838_v17, %v1006_v26  ;;  %v880_v31 = vpop.f32.mrb[25].mxu0  ;;  %v1008_v32 = vpop.f32.mrb[25].mxu1 }
 0x1a1   : > { %v2086_v28 = vpack.c.bf16 %v1270_v24, %v1269_v22  ;;  %v881_v33 = vpop.f32.mrb[26].mxu0  ;;  %v1009_v34 = vpop.f32.mrb[26].mxu1 }
 0x1a2   : > { %2142 = vst [vmem:[%s2856_s22 + $0x28] sm:$0xff] %v2006_v27   ;;  %v1175_v35 = vadd.f32 %v2843_v19, %v1104_v29  ;;  %v1207_v36 = vadd.f32 %v2843_v19, %v1136_v30  ;;  %v1105_v37 = vmul.f32 %v2838_v17, %v881_v33  ;;  %v1137_v38 = vmul.f32 %v2838_v17, %v1009_v34  ;;  %v883_v39 = vpop.f32.mrb[27].mxu0  ;;  %v1011_v40 = vpop.f32.mrb[27].mxu1 }
 0x1a3   : > { %2158 = vst [vmem:[%s2856_s22 + $0xa8] sm:$0xff] %v2086_v28  }
 0x1a4   : > { %v1176_v41 = vadd.f32 %v2843_v19, %v1105_v37  ;;  %v1208_v42 = vadd.f32 %v2843_v19, %v1137_v38  ;;  %v1239_v43 = vmax.f32 %v1175_v35, 0.0  ;;  %v1271_v44 = vmax.f32 %v1207_v36, 0.0 }
 0x1a6   : > { %v1240_v45 = vmax.f32 %v1176_v41, 0.0  ;;  %v1272_v46 = vmax.f32 %v1208_v42, 0.0 }
 0x1a7   : > { %v886_v47 = vpop.f32.mrb[28].mxu0  ;;  %v1014_v48 = vpop.f32.mrb[28].mxu1 }
 0x1a8   : > { %v2011_v49 = vpack.c.bf16 %v1240_v45, %v1239_v43  ;;  %v2091_v50 = vpack.c.bf16 %v1272_v46, %v1271_v44  ;;  %v1106_v51 = vmul.f32 %v2838_v17, %v886_v47  ;;  %v1138_v52 = vmul.f32 %v2838_v17, %v1014_v48  ;;  %v888_v53 = vpop.f32.mrb[29].mxu0  ;;  %v1016_v54 = vpop.f32.mrb[29].mxu1 }
 0x1a9   : > { %v889_v55 = vpop.f32.mrb[30].mxu0  ;;  %v1017_v56 = vpop.f32.mrb[30].mxu1 }
 0x1aa   : > { %2143 = vst [vmem:[%s2856_s22 + $0x30] sm:$0xff] %v2011_v49   ;;  %2159 = vst [vmem:[%s2856_s22 + $0xb0] sm:$0xff] %v2091_v50   ;;  %v1177_v57 = vadd.f32 %v2843_v19, %v1106_v51  ;;  %v1209_v58 = vadd.f32 %v2843_v19, %v1138_v52  ;;  %v1107_v59 = vmul.f32 %v2838_v17, %v889_v55  ;;  %v891_v61 = vpop.f32.mrb[31].mxu0  ;;  %v1019_v62 = vpop.f32.mrb[31].mxu1 }
 0x1ab   : > { %v1139_v60 = vmul.f32 %v2838_v17, %v1017_v56 }
 0x1ac   : > { %v1178_v63 = vadd.f32 %v2843_v19, %v1107_v59  ;;  %v1241_v1 = vmax.f32 %v1177_v57, 0.0  ;;  %v1273_v2 = vmax.f32 %v1209_v58, 0.0 }
 0x1ad   : > { %v1210_v0 = vadd.f32 %v2843_v19, %v1139_v60 }
 0x1ae   : > { %v1242_v3 = vmax.f32 %v1178_v63, 0.0 }
 0x1af   : > { %v1274_v4 = vmax.f32 %v1210_v0, 0.0  ;;  %v894_v5 = vpop.f32.mrb[32].mxu0  ;;  %v1022_v6 = vpop.f32.mrb[32].mxu1 }
 0x1b0   : > { %v2016_v7 = vpack.c.bf16 %v1242_v3, %v1241_v1  ;;  %v1108_v9 = vmul.f32 %v2838_v17, %v894_v5  ;;  %v1140_v10 = vmul.f32 %v2838_v17, %v1022_v6  ;;  %v896_v11 = vpop.f32.mrb[33].mxu0  ;;  %v1024_v12 = vpop.f32.mrb[33].mxu1 }
 0x1b1   : > { %v2096_v8 = vpack.c.bf16 %v1274_v4, %v1273_v2  ;;  %v897_v13 = vpop.f32.mrb[34].mxu0  ;;  %v1025_v14 = vpop.f32.mrb[34].mxu1 }
 0x1b2   : > { %2144 = vst [vmem:[%s2856_s22 + $0x38] sm:$0xff] %v2016_v7   ;;  %v1179_v15 = vadd.f32 %v2843_v19, %v1108_v9  ;;  %v1211_v16 = vadd.f32 %v2843_v19, %v1140_v10  ;;  %v1109_v18 = vmul.f32 %v2838_v17, %v897_v13  ;;  %v1141_v20 = vmul.f32 %v2838_v17, %v1025_v14  ;;  %v899_v21 = vpop.f32.mrb[35].mxu0  ;;  %v1027_v22 = vpop.f32.mrb[35].mxu1 }
 0x1b3   : > { %2160 = vst [vmem:[%s2856_s22 + $0xb8] sm:$0xff] %v2096_v8  }
 0x1b4   : > { %v1180_v23 = vadd.f32 %v2843_v19, %v1109_v18  ;;  %v1212_v24 = vadd.f32 %v2843_v19, %v1141_v20  ;;  %v1243_v25 = vmax.f32 %v1179_v15, 0.0  ;;  %v1275_v26 = vmax.f32 %v1211_v16, 0.0 }
 0x1b6   : > { %v1244_v27 = vmax.f32 %v1180_v23, 0.0  ;;  %v1276_v28 = vmax.f32 %v1212_v24, 0.0 }
 0x1b7   : > { %v902_v29 = vpop.f32.mrb[36].mxu0  ;;  %v1030_v30 = vpop.f32.mrb[36].mxu1 }
 0x1b8   : > { %v2021_v31 = vpack.c.bf16 %v1244_v27, %v1243_v25  ;;  %v2101_v32 = vpack.c.bf16 %v1276_v28, %v1275_v26  ;;  %v1110_v33 = vmul.f32 %v2838_v17, %v902_v29  ;;  %v1142_v34 = vmul.f32 %v2838_v17, %v1030_v30  ;;  %v904_v35 = vpop.f32.mrb[37].mxu0  ;;  %v1032_v36 = vpop.f32.mrb[37].mxu1 }
 0x1b9   : > { %v905_v37 = vpop.f32.mrb[38].mxu0  ;;  %v1033_v38 = vpop.f32.mrb[38].mxu1 }
 0x1ba   : > { %2145 = vst [vmem:[%s2856_s22 + $0x40] sm:$0xff] %v2021_v31   ;;  %2161 = vst [vmem:[%s2856_s22 + $0xc0] sm:$0xff] %v2101_v32   ;;  %v1181_v39 = vadd.f32 %v2843_v19, %v1110_v33  ;;  %v1213_v40 = vadd.f32 %v2843_v19, %v1142_v34  ;;  %v1111_v41 = vmul.f32 %v2838_v17, %v905_v37  ;;  %v907_v43 = vpop.f32.mrb[39].mxu0  ;;  %v1035_v44 = vpop.f32.mrb[39].mxu1 }
 0x1bb   : > { %v1143_v42 = vmul.f32 %v2838_v17, %v1033_v38 }
 0x1bc   : > { %v1182_v45 = vadd.f32 %v2843_v19, %v1111_v41  ;;  %v1245_v47 = vmax.f32 %v1181_v39, 0.0  ;;  %v1277_v48 = vmax.f32 %v1213_v40, 0.0 }
 0x1bd   : > { %v1214_v46 = vadd.f32 %v2843_v19, %v1143_v42 }
 0x1be   : > { %v1246_v49 = vmax.f32 %v1182_v45, 0.0 }
 0x1bf   : > { %v1278_v50 = vmax.f32 %v1214_v46, 0.0  ;;  %v910_v51 = vpop.f32.mrb[40].mxu0  ;;  %v1038_v52 = vpop.f32.mrb[40].mxu1 }
 0x1c0   : > { %v2026_v53 = vpack.c.bf16 %v1246_v49, %v1245_v47  ;;  %v1112_v55 = vmul.f32 %v2838_v17, %v910_v51  ;;  %v1144_v56 = vmul.f32 %v2838_v17, %v1038_v52  ;;  %v912_v57 = vpop.f32.mrb[41].mxu0  ;;  %v1040_v58 = vpop.f32.mrb[41].mxu1 }
 0x1c1   : > { %v2106_v54 = vpack.c.bf16 %v1278_v50, %v1277_v48  ;;  %v913_v59 = vpop.f32.mrb[42].mxu0  ;;  %v1041_v60 = vpop.f32.mrb[42].mxu1 }
 0x1c2   : > { %2146 = vst [vmem:[%s2856_s22 + $0x48] sm:$0xff] %v2026_v53   ;;  %v1183_v61 = vadd.f32 %v2843_v19, %v1112_v55  ;;  %v1215_v62 = vadd.f32 %v2843_v19, %v1144_v56  ;;  %v1113_v63 = vmul.f32 %v2838_v17, %v913_v59  ;;  %v1145_v0 = vmul.f32 %v2838_v17, %v1041_v60  ;;  %v915_v1 = vpop.f32.mrb[43].mxu0  ;;  %v1043_v2 = vpop.f32.mrb[43].mxu1 }
 0x1c3   : > { %2162 = vst [vmem:[%s2856_s22 + $0xc8] sm:$0xff] %v2106_v54  }
 0x1c4   : > { %v1184_v3 = vadd.f32 %v2843_v19, %v1113_v63  ;;  %v1216_v4 = vadd.f32 %v2843_v19, %v1145_v0  ;;  %v1247_v5 = vmax.f32 %v1183_v61, 0.0  ;;  %v1279_v6 = vmax.f32 %v1215_v62, 0.0 }
 0x1c6   : > { %v1248_v7 = vmax.f32 %v1184_v3, 0.0  ;;  %v1280_v8 = vmax.f32 %v1216_v4, 0.0 }
 0x1c7   : > { %v918_v9 = vpop.f32.mrb[44].mxu0  ;;  %v1046_v10 = vpop.f32.mrb[44].mxu1 }
 0x1c8   : > { %v2031_v11 = vpack.c.bf16 %v1248_v7, %v1247_v5  ;;  %v2111_v12 = vpack.c.bf16 %v1280_v8, %v1279_v6  ;;  %v1114_v13 = vmul.f32 %v2838_v17, %v918_v9  ;;  %v1146_v14 = vmul.f32 %v2838_v17, %v1046_v10  ;;  %v920_v15 = vpop.f32.mrb[45].mxu0  ;;  %v1048_v16 = vpop.f32.mrb[45].mxu1 }
 0x1c9   : > { %v921_v18 = vpop.f32.mrb[46].mxu0  ;;  %v1049_v20 = vpop.f32.mrb[46].mxu1 }
 0x1ca   : > { %2147 = vst [vmem:[%s2856_s22 + $0x50] sm:$0xff] %v2031_v11   ;;  %2163 = vst [vmem:[%s2856_s22 + $0xd0] sm:$0xff] %v2111_v12   ;;  %v1185_v21 = vadd.f32 %v2843_v19, %v1114_v13  ;;  %v1217_v22 = vadd.f32 %v2843_v19, %v1146_v14  ;;  %v1115_v23 = vmul.f32 %v2838_v17, %v921_v18  ;;  %v923_v25 = vpop.f32.mrb[47].mxu0  ;;  %v1051_v26 = vpop.f32.mrb[47].mxu1 }
 0x1cb   : > { %v1147_v24 = vmul.f32 %v2838_v17, %v1049_v20 }
 0x1cc   : > { %v1186_v27 = vadd.f32 %v2843_v19, %v1115_v23  ;;  %v1249_v29 = vmax.f32 %v1185_v21, 0.0  ;;  %v1281_v30 = vmax.f32 %v1217_v22, 0.0 }
 0x1cd   : > { %v1218_v28 = vadd.f32 %v2843_v19, %v1147_v24 }
 0x1ce   : > { %v1250_v31 = vmax.f32 %v1186_v27, 0.0 }
 0x1cf   : > { %v1282_v32 = vmax.f32 %v1218_v28, 0.0  ;;  %v926_v33 = vpop.f32.mrb[48].mxu0  ;;  %v1054_v34 = vpop.f32.mrb[48].mxu1 }
 0x1d0   : > { %v2036_v35 = vpack.c.bf16 %v1250_v31, %v1249_v29  ;;  %v1116_v37 = vmul.f32 %v2838_v17, %v926_v33  ;;  %v1148_v38 = vmul.f32 %v2838_v17, %v1054_v34  ;;  %v928_v39 = vpop.f32.mrb[49].mxu0  ;;  %v1056_v40 = vpop.f32.mrb[49].mxu1 }
 0x1d1   : > { %v2116_v36 = vpack.c.bf16 %v1282_v32, %v1281_v30  ;;  %v929_v41 = vpop.f32.mrb[50].mxu0  ;;  %v1057_v42 = vpop.f32.mrb[50].mxu1 }
 0x1d2   : > { %2148 = vst [vmem:[%s2856_s22 + $0x58] sm:$0xff] %v2036_v35   ;;  %v1187_v43 = vadd.f32 %v2843_v19, %v1116_v37  ;;  %v1219_v44 = vadd.f32 %v2843_v19, %v1148_v38  ;;  %v1117_v45 = vmul.f32 %v2838_v17, %v929_v41  ;;  %v1149_v46 = vmul.f32 %v2838_v17, %v1057_v42  ;;  %v931_v47 = vpop.f32.mrb[51].mxu0  ;;  %v1059_v48 = vpop.f32.mrb[51].mxu1 }
 0x1d3   : > { %2164 = vst [vmem:[%s2856_s22 + $0xd8] sm:$0xff] %v2116_v36  }
 0x1d4   : > { %v1188_v49 = vadd.f32 %v2843_v19, %v1117_v45  ;;  %v1220_v50 = vadd.f32 %v2843_v19, %v1149_v46  ;;  %v1251_v51 = vmax.f32 %v1187_v43, 0.0  ;;  %v1283_v52 = vmax.f32 %v1219_v44, 0.0 }
 0x1d6   : > { %v1252_v53 = vmax.f32 %v1188_v49, 0.0  ;;  %v1284_v54 = vmax.f32 %v1220_v50, 0.0 }
 0x1d7   : > { %v934_v55 = vpop.f32.mrb[52].mxu0  ;;  %v1062_v56 = vpop.f32.mrb[52].mxu1 }
 0x1d8   : > { %v2041_v57 = vpack.c.bf16 %v1252_v53, %v1251_v51  ;;  %v2121_v58 = vpack.c.bf16 %v1284_v54, %v1283_v52  ;;  %v1118_v59 = vmul.f32 %v2838_v17, %v934_v55  ;;  %v1150_v60 = vmul.f32 %v2838_v17, %v1062_v56  ;;  %v936_v61 = vpop.f32.mrb[53].mxu0  ;;  %v1064_v62 = vpop.f32.mrb[53].mxu1 }
 0x1d9   : > { %v937_v63 = vpop.f32.mrb[54].mxu0  ;;  %v1065_v0 = vpop.f32.mrb[54].mxu1 }
 0x1da   : > { %2149 = vst [vmem:[%s2856_s22 + $0x60] sm:$0xff] %v2041_v57   ;;  %2165 = vst [vmem:[%s2856_s22 + $0xe0] sm:$0xff] %v2121_v58   ;;  %v1189_v1 = vadd.f32 %v2843_v19, %v1118_v59  ;;  %v1221_v2 = vadd.f32 %v2843_v19, %v1150_v60  ;;  %v1119_v3 = vmul.f32 %v2838_v17, %v937_v63  ;;  %v939_v5 = vpop.f32.mrb[55].mxu0  ;;  %v1067_v6 = vpop.f32.mrb[55].mxu1 }
 0x1db   : > { %v1151_v4 = vmul.f32 %v2838_v17, %v1065_v0 }
 0x1dc   : > { %v1190_v7 = vadd.f32 %v2843_v19, %v1119_v3  ;;  %v1253_v9 = vmax.f32 %v1189_v1, 0.0  ;;  %v1285_v10 = vmax.f32 %v1221_v2, 0.0 }
 0x1dd   : > { %v1222_v8 = vadd.f32 %v2843_v19, %v1151_v4 }
 0x1de   : > { %v1254_v11 = vmax.f32 %v1190_v7, 0.0 }
 0x1df   : > { %v1286_v12 = vmax.f32 %v1222_v8, 0.0  ;;  %v942_v13 = vpop.f32.mrb[56].mxu0  ;;  %v1070_v14 = vpop.f32.mrb[56].mxu1 }
 0x1e0   : > { %v2046_v15 = vpack.c.bf16 %v1254_v11, %v1253_v9  ;;  %v1120_v18 = vmul.f32 %v2838_v17, %v942_v13  ;;  %v1152_v20 = vmul.f32 %v2838_v17, %v1070_v14  ;;  %v944_v21 = vpop.f32.mrb[57].mxu0  ;;  %v1072_v22 = vpop.f32.mrb[57].mxu1 }
 0x1e1   : > { %v2126_v16 = vpack.c.bf16 %v1286_v12, %v1285_v10  ;;  %v945_v23 = vpop.f32.mrb[58].mxu0  ;;  %v1073_v24 = vpop.f32.mrb[58].mxu1 }
 0x1e2   : > { %2150 = vst [vmem:[%s2856_s22 + $0x68] sm:$0xff] %v2046_v15   ;;  %v1191_v25 = vadd.f32 %v2843_v19, %v1120_v18  ;;  %v1223_v26 = vadd.f32 %v2843_v19, %v1152_v20  ;;  %v1121_v27 = vmul.f32 %v2838_v17, %v945_v23  ;;  %v1153_v28 = vmul.f32 %v2838_v17, %v1073_v24  ;;  %v947_v29 = vpop.f32.mrb[59].mxu0  ;;  %v1075_v30 = vpop.f32.mrb[59].mxu1 }
 0x1e3   : > { %2166 = vst [vmem:[%s2856_s22 + $0xe8] sm:$0xff] %v2126_v16  }
 0x1e4   : > { %v1192_v31 = vadd.f32 %v2843_v19, %v1121_v27  ;;  %v1224_v32 = vadd.f32 %v2843_v19, %v1153_v28  ;;  %v1255_v33 = vmax.f32 %v1191_v25, 0.0  ;;  %v1287_v34 = vmax.f32 %v1223_v26, 0.0 }
 0x1e6   : > { %v1256_v35 = vmax.f32 %v1192_v31, 0.0  ;;  %v1288_v36 = vmax.f32 %v1224_v32, 0.0 }
 0x1e7   : > { %v950_v37 = vpop.f32.mrb[60].mxu0  ;;  %v1078_v38 = vpop.f32.mrb[60].mxu1 }
 0x1e8   : > { %v2051_v39 = vpack.c.bf16 %v1256_v35, %v1255_v33  ;;  %v2131_v40 = vpack.c.bf16 %v1288_v36, %v1287_v34  ;;  %v1122_v41 = vmul.f32 %v2838_v17, %v950_v37  ;;  %v1154_v42 = vmul.f32 %v2838_v17, %v1078_v38  ;;  %v952_v43 = vpop.f32.mrb[61].mxu0  ;;  %v1080_v44 = vpop.f32.mrb[61].mxu1 }
 0x1e9   : > { %v953_v45 = vpop.f32.mrb[62].mxu0  ;;  %v1081_v46 = vpop.f32.mrb[62].mxu1 }
 0x1ea   : > { %2151 = vst [vmem:[%s2856_s22 + $0x70] sm:$0xff] %v2051_v39   ;;  %2167 = vst [vmem:[%s2856_s22 + $0xf0] sm:$0xff] %v2131_v40   ;;  %v1193_v47 = vadd.f32 %v2843_v19, %v1122_v41  ;;  %v1225_v48 = vadd.f32 %v2843_v19, %v1154_v42  ;;  %v1123_v49 = vmul.f32 %v2838_v17, %v953_v45  ;;  %v955_v51 = vpop.f32.mrb[63].mxu0  ;;  %v1083_v52 = vpop.f32.mrb[63].mxu1 }
 0x1eb   : > { %v1155_v50 = vmul.f32 %v2838_v17, %v1081_v46 }
 0x1ec   : > { %v1194_v53 = vadd.f32 %v2843_v19, %v1123_v49  ;;  %v1257_v55 = vmax.f32 %v1193_v47, 0.0  ;;  %v1289_v56 = vmax.f32 %v1225_v48, 0.0 }
 0x1ed   : > { %v1226_v54 = vadd.f32 %v2843_v19, %v1155_v50 }
 0x1ee   : > { %v1258_v57 = vmax.f32 %v1194_v53, 0.0 }
 0x1ef   : > { %v1290_v58 = vmax.f32 %v1226_v54, 0.0 }
 0x1f0   : > { %v2056_v17 = vpack.c.bf16 %v1258_v57, %v1257_v55 }
 0x1f1   : > { %v2136_v59 = vpack.c.bf16 %v1290_v58, %v1289_v56 }
 0x1f2   : > { %2152 = vst [vmem:[%s2856_s22 + $0x78] sm:$0xff] %v2056_v17  }
 0x1f3   : > { %2168 = vst [vmem:[%s2856_s22 + $0xf8] sm:$0xff] %v2136_v59  }
 0x1f4   : > { %2464 = shalt.err (!%p2461_p5)
}
 0x1f5   : > { %s2465_s23 = scalar_lea.hbm %s3011_s6, 4096  ;;  %s2469_s14 = scalar_lea.hbm %s3067_s4, 16384 }
 0x1f6   : > { %p2466_p9 = scmp.ne.s32.totalorder %s3011_s6, %s2465_s23  ;;  %p2470_p3 = scmp.lt.u32.totalorder %s3011_s6, %s3067_s4 }
 0x1f7   : > { %p2471_p7 = scmp.lt.u32.totalorder %s2469_s14, %s2465_s23  ;;  %p2473_p4 = scmp.lt.u32.totalorder %s2465_s23, %s3011_s6 }
 0x1f8   : > { %p2467_p1 = pnand %p2466_p9, %p2669_p11 }
 0x1f9   : > { %p2472_p13 = por %p2471_p7, %p2470_p3 }
 0x1fa   : > { %p2468_p2 = pneg %p2467_p1 }
 0x1fb   : > { %p2474_p6 = por %p2473_p4, %p2472_p13 }
 0x1fd   : > { %p2475_p8 = pnand %p2474_p6, %p2468_p2 }
 0x1ff   : > { %2478 = shalt.err (!%p2475_p8)
}
 0x200   : > { %s2547_s28 = smov 64   ;;  %s2548_s24 = smov 4  }
 0x201   : > { %2207 = dma.vmem_to_hbm [thread:$0]  (%p2669_p11), %s3013_s13, 4096, %s3011_s6, %s1612_s18, %s2547_s28, %s2547_s28, %s2548_s24  }
 0x202 PF: > { %p2224_p12 = scmp.ge.s32.totalorder %s2537_s20, 2  ;;  %s1641_s30 = sand.u32 1, %s2517_s15  }
 0x203   : > { %p3085_p10 = scmp.ne.s32.totalorder %s3075_s26, 0  ;;  %s1642_s9 = scalar_lea.sflag [#allocation4], %s1641_s30 }
 0x205   : > { %p2218_p0 = pnand %p2224_p12, %p3085_p10 }
 0x207   : > { %2512 = dma.done.wait (!%p2218_p0), %s1642_s9, 4096  }
 0x208   : > { %2514 = vsyncadd (!%p2218_p0), %s1642_s9, 4294963200  ;;  %s21_s20 = sadd.s32 1, %s2537_s20   ;;  %s3086_s15 = smov %s2521_s16 }
 0x209   : > { %p18_p5 = scmp.ge.s32.totalorder %s21_s20, 6   ;;  %s3087_s16 = smov %s2525_s17 }
 0x20a   : > { %s3088_s17 = smov %s2678_s10  ;;  %s3089_s18 = smov %s2533_s19 }
 0x20b   : > { %s3090_s19 = smov %s3092_s5  ;;  %20 = sbr.rel (!%p18_p5) target bundleno = 7 (0x7), region = 92 }
 0x212   :  { %1647 = vsyncpa [#allocation3], 1 }
 0x213   :  { %1649 = vsyncpa [#allocation3 + $0x1], 1 }
 0x214   :  { %1650 = vsyncpa [#allocation6], 1 }
 0x215   :  { %1651 = vsyncpa [#allocation4], 1 }
 0x216   :  { %1653 = vsyncpa [#allocation4 + $0x1], 1 }

</bundles_post_ra>
